<compile_context>
chip_gen: v7x
topology: tpu7x:2x2x1
jax: 0.10.0
libtpu: 0.0.40
codegen_flags: <defaults>
</compile_context>

<pallas_src>
import numpy as np

import jax
import jax.numpy as jnp
from jax.experimental import pallas as pl
from jax.experimental.pallas import tpu as pltpu

NUM_CLASSES = 16
REG_MAX = 8
STRIDES = (8, 16, 32)
IMAGE_SIZE = (32, 32)            # (W, H)
CHS = (3, 8, 16, 24, 32, 48)     # synthetic backbone channel progression
N_LAYERS = 5
N_SCALES = 3
SLAB_COLS = 256                  # lane width of both packed constant slabs


def _round_up(x, m):
    return (x + m - 1) // m * m


def _build_meta():
    """Static layer/scale geometry + row offsets inside the two constant slabs."""
    H, W = IMAGE_SIZE[1], IMAGE_SIZE[0]
    layers, scales = [], []
    h, w = H, W
    w_off = 0                    # row offset inside the bf16 weight slab
    c_off = 0                    # row offset inside the f32 constant slab
    for i in range(N_LAYERS):
        ci, co = CHS[i], CHS[i + 1]
        ho, wo = h // 2, w // 2
        layers.append(dict(h=h, w=w, ci=ci, co=co, ho=ho, wo=wo,
                           m_off=w_off, b_off=c_off))
        w_off = _round_up(w_off + 3 * w * ci, 16)   # bf16 sublane packing
        c_off = _round_up(c_off + 1, 8)
        h, w = ho, wo

    out_row = 0
    for s in range(N_SCALES):
        L = layers[N_LAYERS - N_SCALES + s]
        ho, wo, c = L["ho"], L["wo"], L["co"]
        scales.append(dict(ho=ho, wo=wo, c=c, stride=STRIDES[s],
                           hw_off=w_off, hb_off=c_off, out_row=out_row))
        w_off = _round_up(w_off + wo * c, 16)
        c_off = _round_up(c_off + 1, 8)
        out_row += ho
    for S in scales:
        S["ss_off"] = c_off
        c_off = _round_up(c_off + 1, 8)
    for S in scales:
        S["a_off"] = c_off
        c_off = _round_up(c_off + S["ho"], 8)

    return dict(
        layers=layers, scales=scales,
        w_rows=_round_up(w_off, 16), c_rows=_round_up(c_off, 8),
        out_rows=_round_up(out_row, 8), out_cols=128,
        h=H, w=W, cin=CHS[0],
        pad_rows=_round_up(H + 2, 8),
        pad_cols=max(L["w"] * L["ci"] for L in layers),
        gat_rows=max(L["ho"] for L in layers),
        gat_cols=max(3 * L["w"] * L["ci"] for L in layers))


META = _build_meta()


# ------------------------------ Pallas kernel -------------------------------

def _fused_kernel(x_ref, w_ref, c_ref, o_ref, pad_ref, gat_ref):
    """Backbone (5x s2 3x3 conv+SiLU) + heads + DFL/Vec2Box for one image."""
    layers, scales = META["layers"], META["scales"]

    o_ref[...] = jnp.zeros(o_ref.shape, o_ref.dtype)
    act = x_ref[...]                                   # (H, W*Cin) f32
    feats = []

    # ---- backbone: each layer is ONE merged-tap MXU GEMM ----
    for li, L in enumerate(layers):
        h, ho = L["h"], L["ho"]
        wc = L["w"] * L["ci"]
        oc = L["wo"] * L["co"]

        # stage zero-padded activation rows in the f32 VMEM scratch
        zero_row = jnp.zeros((1, wc), jnp.float32)
        pad_ref[0:1, 0:wc] = zero_row
        pad_ref[h + 1:h + 2, 0:wc] = zero_row
        pad_ref[1:h + 1, 0:wc] = act

        # gather the three ky taps with stride-2 sublane reads into
        # contiguous lane blocks -> one (ho, 3*W*Cin) bf16 GEMM operand
        for ky in range(3):
            tap = pad_ref[pl.ds(ky, ho, stride=2), pl.ds(0, wc)]
            gat_ref[0:ho, ky * wc:(ky + 1) * wc] = tap.astype(jnp.bfloat16)

        g = gat_ref[0:ho, 0:3 * wc]                               # (ho, 3*W*Cin)
        m = w_ref[L["m_off"]:L["m_off"] + 3 * wc, 0:oc]           # (3*W*Cin, Wo*Cout)
        pre = jnp.dot(g, m, preferred_element_type=jnp.float32)
        pre = pre + c_ref[L["b_off"]:L["b_off"] + 1, 0:oc]
        act = pre * jax.nn.sigmoid(pre)                           # SiLU (EUP)
        if li >= N_LAYERS - N_SCALES:
            feats.append(act)                                     # P3 / P4 / P5

    # ---- heads + exact per-group DFL expectation + Vec2Box decode ----
    for si, S in enumerate(scales):
        ho, wo = S["ho"], S["wo"]
        ncls = wo * NUM_CLASSES
        nb = wo * 4
        ntot = ncls + REG_MAX * nb

        f = feats[si].astype(jnp.bfloat16)                        # (ho, wo*c)
        hw = w_ref[S["hw_off"]:S["hw_off"] + wo * S["c"], 0:ntot]
        head = jnp.dot(f, hw, preferred_element_type=jnp.float32)
        head = head + c_ref[S["hb_off"]:S["hb_off"] + 1, 0:ntot]

        cls_slab = head[:, 0:ncls]                                # (ho, wo*16)

        # DFL: per-8-bin-group softmax expectation (bin-major lane layout).
        # Per-group max => den >= 1, exact, no clamp / overflow hazards.
        bins = [head[:, ncls + r * nb:ncls + (r + 1) * nb] for r in range(REG_MAX)]
        gmax = bins[0]
        for r in range(1, REG_MAX):
            gmax = jnp.maximum(gmax, bins[r])
        den = jnp.zeros_like(gmax)
        num = jnp.zeros_like(gmax)
        for r in range(REG_MAX):
            e = jnp.exp(bins[r] - gmax)
            den = den + e
            if r:
                num = num + float(r) * e
        expect = num / den                                        # exact

        ss = c_ref[S["ss_off"]:S["ss_off"] + 1, 0:nb]             # (+/-stride)
        anc = c_ref[S["a_off"]:S["a_off"] + ho, 0:nb]             # anchor centers
        box_slab = anc + expect * ss                              # XYXY

        # two static-offset stores into the lane-dense output slab
        r0 = S["out_row"]
        o_ref[r0:r0 + ho, 0:ncls] = cls_slab
        o_ref[r0:r0 + ho, ncls:ncls + nb] = box_slab


def _pallas_forward(xp, wslab, cslab):
    B = xp.shape[0]
    H, W, C = META["h"], META["w"], META["cin"]
    return pl.pallas_call(
        _fused_kernel,
        out_shape=jax.ShapeDtypeStruct((B, META["out_rows"], META["out_cols"]),
                                       jnp.float32),
        grid=(B,),
        in_specs=[
            pl.BlockSpec((None, H, W * C), lambda b: (b, 0, 0)),
            pl.BlockSpec((META["w_rows"], SLAB_COLS), lambda b: (0, 0)),
            pl.BlockSpec((META["c_rows"], SLAB_COLS), lambda b: (0, 0)),
        ],
        out_specs=pl.BlockSpec((None, META["out_rows"], META["out_cols"]),
                               lambda b: (b, 0, 0)),
        scratch_shapes=[
            pltpu.VMEM((META["pad_rows"], META["pad_cols"]), jnp.float32),
            pltpu.VMEM((META["gat_rows"], META["gat_cols"]), jnp.bfloat16),
        ],
        compiler_params=pltpu.CompilerParams(
            dimension_semantics=("parallel",)),
    )(xp, wslab, cslab)


@jax.jit
def yolov9_forward(x_nchw, wslab, cslab):
    """Equivalent of YOLOv9WithPostprocess.forward -> (preds_cls, preds_box)."""
    x = jnp.transpose(x_nchw, (0, 2, 3, 1)).astype(jnp.float32)   # NCHW -> NHWC
    B, H, W, C = x.shape
    xp = x.reshape(B, H, W * C)

    outs = _pallas_forward(xp, wslab, cslab)                      # (B, 8, 128)

    # wrapper-side layout plumbing only: slab -> (B, N, C) views
    cls_parts, box_parts = [], []
    for S in META["scales"]:
        ho, wo, r0 = S["ho"], S["wo"], S["out_row"]
        ncls, nb = wo * NUM_CLASSES, wo * 4
        blk = outs[:, r0:r0 + ho, :]
        cls_parts.append(blk[:, :, 0:ncls].reshape(B, ho * wo, NUM_CLASSES))
        box_parts.append(blk[:, :, ncls:ncls + nb].reshape(B, ho * wo, 4))
    preds_cls = jnp.concatenate(cls_parts, axis=1)                # (B, N, 16)
    preds_box = jnp.concatenate(box_parts, axis=1)                # (B, N, 4) XYXY
    return preds_cls, preds_box


# --------------------------- host-side weight packing ------------------------

def pack_params(params):
    """Pack all weights / constants into two lane-dense slabs (done once, host side)."""
    wslab = np.zeros((META["w_rows"], SLAB_COLS), np.float32)
    cslab = np.zeros((META["c_rows"], SLAB_COLS), np.float32)

    for L, (w_conv, b) in zip(META["layers"], params["backbone"]):
        w_conv = np.asarray(w_conv, np.float32)
        b = np.asarray(b, np.float32)
        w, ci, co, wo = L["w"], L["ci"], L["co"], L["wo"]
        # merged-tap matrix: row = ky*W*Cin + iw*Cin + ci, col = ox*Cout + co
        m = np.zeros((3 * w * ci, wo * co), np.float32)
        for ky in range(3):
            for kx in range(3):
                for ox in range(wo):
                    iw = 2 * ox - 1 + kx
                    if 0 <= iw < w:                  # width padding folded as zeros
                        r0 = ky * w * ci + iw * ci
                        m[r0:r0 + ci, ox * co:(ox + 1) * co] += w_conv[ky, kx]
        wslab[L["m_off"]:L["m_off"] + 3 * w * ci, :wo * co] = m
        cslab[L["b_off"], :wo * co] = np.tile(b, wo)

    for S, (cw, cb, aw, ab) in zip(META["scales"], params["heads"]):
        cw, cb = np.asarray(cw, np.float32), np.asarray(cb, np.float32)
        aw, ab = np.asarray(aw, np.float32), np.asarray(ab, np.float32)
        ho, wo, c, stride = S["ho"], S["wo"], S["c"], S["stride"]
        ncls, nb = wo * NUM_CLASSES, wo * 4

        # fused cls + anchor head (1x1 conv as block GEMM); anchor block is
        # bin-MAJOR: lane = ncls + r*nb + wi*4 + side.
        # TODO(synk): bin-major/side-minor ordering is a property of these
        # synthetic heads; verify against Anchor2Vec before loading real weights.
        hw = np.zeros((wo * c, ncls + REG_MAX * nb), np.float32)
        hb = np.zeros((ncls + REG_MAX * nb,), np.float32)
        for wi in range(wo):
            hw[wi * c:(wi + 1) * c, wi * NUM_CLASSES:(wi + 1) * NUM_CLASSES] = cw
            hb[wi * NUM_CLASSES:(wi + 1) * NUM_CLASSES] = cb
        for r in range(REG_MAX):
            for wi in range(wo):
                col = ncls + r * nb + wi * 4
                hw[wi * c:(wi + 1) * c, col:col + 4] = aw[:, :, r]
                hb[col:col + 4] = ab[:, r]
        wslab[S["hw_off"]:S["hw_off"] + wo * c, :hw.shape[1]] = hw
        cslab[S["hb_off"], :hb.shape[0]] = hb

        # sign * stride per side (l, t -> -, r, b -> +) and anchor centers
        cslab[S["ss_off"], :nb] = np.tile(
            np.array([-stride, -stride, stride, stride], np.float32), wo)
        anc = np.zeros((ho, nb), np.float32)
        for hi in range(ho):
            for wi in range(wo):
                cx = (wi + 0.5) * stride
                cy = (hi + 0.5) * stride
                anc[hi, wi * 4:(wi + 1) * 4] = (cx, cy, cx, cy)
        cslab[S["a_off"]:S["a_off"] + ho, :nb] = anc

    return jnp.asarray(wslab, jnp.bfloat16), jnp.asarray(cslab, jnp.float32)


def init_params(key):
    keys = jax.random.split(key, 2 * N_LAYERS + 4 * N_SCALES)
    ki = 0
    params = {"backbone": [], "heads": []}
    for i in range(N_LAYERS):
        w = 0.05 * jax.random.normal(keys[ki], (3, 3, CHS[i], CHS[i + 1]), jnp.float32); ki += 1
        b = 0.01 * jax.random.normal(keys[ki], (CHS[i + 1],), jnp.float32); ki += 1
        params["backbone"].append((w, b))
    for s in range(N_SCALES):
        c = CHS[N_LAYERS - N_SCALES + s + 1]          # 24 / 32 / 48
        cw = 0.05 * jax.random.normal(keys[ki], (c, NUM_CLASSES), jnp.float32); ki += 1
        cb = 0.01 * jax.random.normal(keys[ki], (NUM_CLASSES,), jnp.float32); ki += 1
        aw = 0.05 * jax.random.normal(keys[ki], (c, 4, REG_MAX), jnp.float32); ki += 1
        ab = 0.01 * jax.random.normal(keys[ki], (4, REG_MAX), jnp.float32); ki += 1
        params["heads"].append((cw, cb, aw, ab))
    return params


if __name__ == "__main__":
    root = jax.random.PRNGKey(0)
    k_x, k_p = jax.random.split(root)
    x = jax.random.normal(k_x, (2, 3, IMAGE_SIZE[1], IMAGE_SIZE[0]), jnp.float32)
    params = init_params(k_p)
    wslab, cslab = pack_params(params)

    preds_cls, preds_box = yolov9_forward(x, wslab, cslab)
    jax.block_until_ready((preds_cls, preds_box))

    n_anchors = sum((IMAGE_SIZE[0] // s) * (IMAGE_SIZE[1] // s) for s in STRIDES)
    assert preds_cls.shape == (2, n_anchors, NUM_CLASSES), preds_cls.shape
    assert preds_box.shape == (2, n_anchors, 4), preds_box.shape
    assert bool(jnp.all(jnp.isfinite(preds_cls)))
    assert bool(jnp.all(jnp.isfinite(preds_box)))
    print("KERNEL_OK")
</pallas_src>

<mosaic_0001>
module attributes {stable_mosaic.version = 11 : i64} {
  func.func @_fused_kernel(%arg0: i32, %arg1: memref<1x32x96xf32, #tpu.memory_space<vmem>>, %arg2: memref<1744x256xbf16, #tpu.memory_space<vmem>>, %arg3: memref<112x256xf32, #tpu.memory_space<vmem>>, %arg4: memref<1x8x128xf32, #tpu.memory_space<vmem>>, %arg5: memref<40x128xf32, #tpu.memory_space<vmem>>, %arg6: memref<16x384xbf16, #tpu.memory_space<vmem>>) attributes {dimension_semantics = [#tpu.dimension_semantics<parallel>], iteration_bounds = array<i64: 2>, scalar_prefetch = 0 : i64, scratch_operands = 2 : i64, tpu.core_type = #tpu.core_type<tc>, window_params = [{transform_indices = @transform_0, window_bounds = array<i64: 1, 32, 96>}, {pipeline_mode = #tpu.pipeline_mode<synchronous>, transform_indices = @transform_1, window_bounds = array<i64: 1744, 256>}, {pipeline_mode = #tpu.pipeline_mode<synchronous>, transform_indices = @transform_2, window_bounds = array<i64: 112, 256>}, {transform_indices = @transform_3, window_bounds = array<i64: 1, 8, 128>}]} {
    %cst = arith.constant 0.000000e+00 : f32
    %0 = vector.broadcast %cst : f32 to vector<8x128xf32>
    %c0 = arith.constant 0 : index
    %c0_0 = arith.constant 0 : index
    %c0_1 = arith.constant 0 : index
    %1 = vector.load %arg4[%c0, %c0_0, %c0_1] : memref<1x8x128xf32, #tpu.memory_space<vmem>>, vector<1x8x128xf32>
    %2 = vector.shape_cast %1 : vector<1x8x128xf32> to vector<8x128xf32>
    %3 = vector.shape_cast %0 : vector<8x128xf32> to vector<1x8x128xf32>
    tpu.vector_store %arg4[%c0, %c0_0, %c0_1], %3 {strides = array<i32>} : memref<1x8x128xf32, #tpu.memory_space<vmem>>, vector<1x8x128xf32>,
    %c0_2 = arith.constant 0 : index
    %c0_3 = arith.constant 0 : index
    %c0_4 = arith.constant 0 : index
    %4 = vector.load %arg1[%c0_2, %c0_3, %c0_4] : memref<1x32x96xf32, #tpu.memory_space<vmem>>, vector<1x32x96xf32>
    %5 = vector.shape_cast %4 : vector<1x32x96xf32> to vector<32x96xf32>
    %cst_5 = arith.constant 0.000000e+00 : f32
    %6 = vector.broadcast %cst_5 : f32 to vector<1x96xf32>
    %c0_6 = arith.constant 0 : index
    %c0_7 = arith.constant 0 : index
    %7 = vector.load %arg5[%c0_6, %c0_7] : memref<40x128xf32, #tpu.memory_space<vmem>>, vector<1x96xf32>
    tpu.vector_store %arg5[%c0_6, %c0_7], %6 {strides = array<i32>} : memref<40x128xf32, #tpu.memory_space<vmem>>, vector<1x96xf32>,
    %c33 = arith.constant 33 : index
    %c0_8 = arith.constant 0 : index
    %8 = vector.load %arg5[%c33, %c0_8] : memref<40x128xf32, #tpu.memory_space<vmem>>, vector<1x96xf32>
    tpu.vector_store %arg5[%c33, %c0_8], %6 {strides = array<i32>} : memref<40x128xf32, #tpu.memory_space<vmem>>, vector<1x96xf32>,
    %c1 = arith.constant 1 : index
    %c0_9 = arith.constant 0 : index
    %9 = vector.load %arg5[%c1, %c0_9] : memref<40x128xf32, #tpu.memory_space<vmem>>, vector<32x96xf32>
    tpu.vector_store %arg5[%c1, %c0_9], %5 {strides = array<i32>} : memref<40x128xf32, #tpu.memory_space<vmem>>, vector<32x96xf32>,
    %c0_10 = arith.constant 0 : index
    %c0_11 = arith.constant 0 : index
    %10 = tpu.strided_load %arg5[%c0_10, %c0_11] {strides = array<i32: 2, 1>} : memref<40x128xf32, #tpu.memory_space<vmem>>, vector<16x96xf32>
    %11 = arith.truncf %10 : vector<16x96xf32> to vector<16x96xbf16>
    %c0_12 = arith.constant 0 : index
    %c0_13 = arith.constant 0 : index
    %12 = vector.load %arg6[%c0_12, %c0_13] : memref<16x384xbf16, #tpu.memory_space<vmem>>, vector<16x96xbf16>
    tpu.vector_store %arg6[%c0_12, %c0_13], %11 {strides = array<i32>} : memref<16x384xbf16, #tpu.memory_space<vmem>>, vector<16x96xbf16>,
    %c1_14 = arith.constant 1 : index
    %c0_15 = arith.constant 0 : index
    %13 = tpu.strided_load %arg5[%c1_14, %c0_15] {strides = array<i32: 2, 1>} : memref<40x128xf32, #tpu.memory_space<vmem>>, vector<16x96xf32>
    %14 = arith.truncf %13 : vector<16x96xf32> to vector<16x96xbf16>
    %c0_16 = arith.constant 0 : index
    %c96 = arith.constant 96 : index
    %15 = vector.load %arg6[%c0_16, %c96] : memref<16x384xbf16, #tpu.memory_space<vmem>>, vector<16x96xbf16>
    tpu.vector_store %arg6[%c0_16, %c96], %14 {strides = array<i32>} : memref<16x384xbf16, #tpu.memory_space<vmem>>, vector<16x96xbf16>,
    %c2 = arith.constant 2 : index
    %c0_17 = arith.constant 0 : index
    %16 = tpu.strided_load %arg5[%c2, %c0_17] {strides = array<i32: 2, 1>} : memref<40x128xf32, #tpu.memory_space<vmem>>, vector<16x96xf32>
    %17 = arith.truncf %16 : vector<16x96xf32> to vector<16x96xbf16>
    %c0_18 = arith.constant 0 : index
    %c192 = arith.constant 192 : index
    %18 = vector.load %arg6[%c0_18, %c192] : memref<16x384xbf16, #tpu.memory_space<vmem>>, vector<16x96xbf16>
    tpu.vector_store %arg6[%c0_18, %c192], %17 {strides = array<i32>} : memref<16x384xbf16, #tpu.memory_space<vmem>>, vector<16x96xbf16>,
    %c0_19 = arith.constant 0 : index
    %c0_20 = arith.constant 0 : index
    %19 = vector.load %arg6[%c0_19, %c0_20] : memref<16x384xbf16, #tpu.memory_space<vmem>>, vector<16x288xbf16>
    %c0_21 = arith.constant 0 : index
    %c0_22 = arith.constant 0 : index
    %20 = vector.load %arg2[%c0_21, %c0_22] : memref<1744x256xbf16, #tpu.memory_space<vmem>>, vector<288x128xbf16>
    %cst_23 = arith.constant dense<0.000000e+00> : vector<16x128xf32>
    %21 = tpu.matmul %19, %20, %cst_23 {dimension_numbers = #tpu.dot_dimension_numbers<[1], [0], [0], [1], [0, 0, 1, 1], [], []>} : vector<16x288xbf16>, vector<288x128xbf16>, vector<16x128xf32> -> vector<16x128xf32>
    %c0_24 = arith.constant 0 : index
    %c0_25 = arith.constant 0 : index
    %22 = vector.load %arg3[%c0_24, %c0_25] : memref<112x256xf32, #tpu.memory_space<vmem>>, vector<1x128xf32>
    %23 = vector.broadcast %22 : vector<1x128xf32> to vector<16x128xf32>
    %24 = arith.addf %21, %23 : vector<16x128xf32>
    %25 = arith.negf %24 : vector<16x128xf32>
    %26 = math.exp %25 : vector<16x128xf32>
    %cst_26 = arith.constant 1.000000e+00 : f32
    %27 = vector.broadcast %cst_26 : f32 to vector<16x128xf32>
    %28 = arith.addf %27, %26 : vector<16x128xf32>
    %29 = arith.divf %27, %28 : vector<16x128xf32>
    %30 = arith.mulf %24, %29 : vector<16x128xf32>
    %cst_27 = arith.constant 0.000000e+00 : f32
    %31 = vector.broadcast %cst_27 : f32 to vector<1x128xf32>
    %c0_28 = arith.constant 0 : index
    %c0_29 = arith.constant 0 : index
    %32 = vector.load %arg5[%c0_28, %c0_29] : memref<40x128xf32, #tpu.memory_space<vmem>>, vector<1x128xf32>
    tpu.vector_store %arg5[%c0_28, %c0_29], %31 {strides = array<i32>} : memref<40x128xf32, #tpu.memory_space<vmem>>, vector<1x128xf32>,
    %c17 = arith.constant 17 : index
    %c0_30 = arith.constant 0 : index
    %33 = vector.load %arg5[%c17, %c0_30] : memref<40x128xf32, #tpu.memory_space<vmem>>, vector<1x128xf32>
    tpu.vector_store %arg5[%c17, %c0_30], %31 {strides = array<i32>} : memref<40x128xf32, #tpu.memory_space<vmem>>, vector<1x128xf32>,
    %c1_31 = arith.constant 1 : index
    %c0_32 = arith.constant 0 : index
    %34 = vector.load %arg5[%c1_31, %c0_32] : memref<40x128xf32, #tpu.memory_space<vmem>>, vector<16x128xf32>
    tpu.vector_store %arg5[%c1_31, %c0_32], %30 {strides = array<i32>} : memref<40x128xf32, #tpu.memory_space<vmem>>, vector<16x128xf32>,
    %c0_33 = arith.constant 0 : index
    %c0_34 = arith.constant 0 : index
    %35 = tpu.strided_load %arg5[%c0_33, %c0_34] {strides = array<i32: 2, 1>} : memref<40x128xf32, #tpu.memory_space<vmem>>, vector<8x128xf32>
    %36 = arith.truncf %35 : vector<8x128xf32> to vector<8x128xbf16>
    %c0_35 = arith.constant 0 : index
    %c0_36 = arith.constant 0 : index
    %37 = vector.load %arg6[%c0_35, %c0_36] : memref<16x384xbf16, #tpu.memory_space<vmem>>, vector<8x128xbf16>
    tpu.vector_store %arg6[%c0_35, %c0_36], %36 {strides = array<i32>} : memref<16x384xbf16, #tpu.memory_space<vmem>>, vector<8x128xbf16>,
    %c1_37 = arith.constant 1 : index
    %c0_38 = arith.constant 0 : index
    %38 = tpu.strided_load %arg5[%c1_37, %c0_38] {strides = array<i32: 2, 1>} : memref<40x128xf32, #tpu.memory_space<vmem>>, vector<8x128xf32>
    %39 = arith.truncf %38 : vector<8x128xf32> to vector<8x128xbf16>
    %c0_39 = arith.constant 0 : index
    %c128 = arith.constant 128 : index
    %40 = vector.load %arg6[%c0_39, %c128] : memref<16x384xbf16, #tpu.memory_space<vmem>>, vector<8x128xbf16>
    tpu.vector_store %arg6[%c0_39, %c128], %39 {strides = array<i32>} : memref<16x384xbf16, #tpu.memory_space<vmem>>, vector<8x128xbf16>,
    %c2_40 = arith.constant 2 : index
    %c0_41 = arith.constant 0 : index
    %41 = tpu.strided_load %arg5[%c2_40, %c0_41] {strides = array<i32: 2, 1>} : memref<40x128xf32, #tpu.memory_space<vmem>>, vector<8x128xf32>
    %42 = arith.truncf %41 : vector<8x128xf32> to vector<8x128xbf16>
    %c0_42 = arith.constant 0 : index
    %c256 = arith.constant 256 : index
    %43 = vector.load %arg6[%c0_42, %c256] : memref<16x384xbf16, #tpu.memory_space<vmem>>, vector<8x128xbf16>
    tpu.vector_store %arg6[%c0_42, %c256], %42 {strides = array<i32>} : memref<16x384xbf16, #tpu.memory_space<vmem>>, vector<8x128xbf16>,
    %c0_43 = arith.constant 0 : index
    %c0_44 = arith.constant 0 : index
    %44 = vector.load %arg6[%c0_43, %c0_44] : memref<16x384xbf16, #tpu.memory_space<vmem>>, vector<8x384xbf16>
    %c288 = arith.constant 288 : index
    %c0_45 = arith.constant 0 : index
    %45 = vector.load %arg2[%c288, %c0_45] : memref<1744x256xbf16, #tpu.memory_space<vmem>>, vector<384x128xbf16>
    %cst_46 = arith.constant dense<0.000000e+00> : vector<8x128xf32>
    %46 = tpu.matmul %44, %45, %cst_46 {dimension_numbers = #tpu.dot_dimension_numbers<[1], [0], [0], [1], [0, 0, 1, 1], [], []>} : vector<8x384xbf16>, vector<384x128xbf16>, vector<8x128xf32> -> vector<8x128xf32>
    %c8 = arith.constant 8 : index
    %c0_47 = arith.constant 0 : index
    %47 = vector.load %arg3[%c8, %c0_47] : memref<112x256xf32, #tpu.memory_space<vmem>>, vector<1x128xf32>
    %48 = vector.broadcast %47 : vector<1x128xf32> to vector<8x128xf32>
    %49 = arith.addf %46, %48 : vector<8x128xf32>
    %50 = arith.negf %49 : vector<8x128xf32>
    %51 = math.exp %50 : vector<8x128xf32>
    %cst_48 = arith.constant 1.000000e+00 : f32
    %52 = vector.broadcast %cst_48 : f32 to vector<8x128xf32>
    %53 = arith.addf %52, %51 : vector<8x128xf32>
    %54 = arith.divf %52, %53 : vector<8x128xf32>
    %55 = arith.mulf %49, %54 : vector<8x128xf32>
    %cst_49 = arith.constant 0.000000e+00 : f32
    %56 = vector.broadcast %cst_49 : f32 to vector<1x128xf32>
    %c0_50 = arith.constant 0 : index
    %c0_51 = arith.constant 0 : index
    %57 = vector.load %arg5[%c0_50, %c0_51] : memref<40x128xf32, #tpu.memory_space<vmem>>, vector<1x128xf32>
    tpu.vector_store %arg5[%c0_50, %c0_51], %56 {strides = array<i32>} : memref<40x128xf32, #tpu.memory_space<vmem>>, vector<1x128xf32>,
    %c9 = arith.constant 9 : index
    %c0_52 = arith.constant 0 : index
    %58 = vector.load %arg5[%c9, %c0_52] : memref<40x128xf32, #tpu.memory_space<vmem>>, vector<1x128xf32>
    tpu.vector_store %arg5[%c9, %c0_52], %56 {strides = array<i32>} : memref<40x128xf32, #tpu.memory_space<vmem>>, vector<1x128xf32>,
    %c1_53 = arith.constant 1 : index
    %c0_54 = arith.constant 0 : index
    %59 = vector.load %arg5[%c1_53, %c0_54] : memref<40x128xf32, #tpu.memory_space<vmem>>, vector<8x128xf32>
    tpu.vector_store %arg5[%c1_53, %c0_54], %55 {strides = array<i32>} : memref<40x128xf32, #tpu.memory_space<vmem>>, vector<8x128xf32>,
    %c0_55 = arith.constant 0 : index
    %c0_56 = arith.constant 0 : index
    %60 = tpu.strided_load %arg5[%c0_55, %c0_56] {strides = array<i32: 2, 1>} : memref<40x128xf32, #tpu.memory_space<vmem>>, vector<4x128xf32>
    %61 = arith.truncf %60 : vector<4x128xf32> to vector<4x128xbf16>
    %c0_57 = arith.constant 0 : index
    %c0_58 = arith.constant 0 : index
    %62 = vector.load %arg6[%c0_57, %c0_58] : memref<16x384xbf16, #tpu.memory_space<vmem>>, vector<4x128xbf16>
    tpu.vector_store %arg6[%c0_57, %c0_58], %61 {strides = array<i32>} : memref<16x384xbf16, #tpu.memory_space<vmem>>, vector<4x128xbf16>,
    %c1_59 = arith.constant 1 : index
    %c0_60 = arith.constant 0 : index
    %63 = tpu.strided_load %arg5[%c1_59, %c0_60] {strides = array<i32: 2, 1>} : memref<40x128xf32, #tpu.memory_space<vmem>>, vector<4x128xf32>
    %64 = arith.truncf %63 : vector<4x128xf32> to vector<4x128xbf16>
    %c0_61 = arith.constant 0 : index
    %c128_62 = arith.constant 128 : index
    %65 = vector.load %arg6[%c0_61, %c128_62] : memref<16x384xbf16, #tpu.memory_space<vmem>>, vector<4x128xbf16>
    tpu.vector_store %arg6[%c0_61, %c128_62], %64 {strides = array<i32>} : memref<16x384xbf16, #tpu.memory_space<vmem>>, vector<4x128xbf16>,
    %c2_63 = arith.constant 2 : index
    %c0_64 = arith.constant 0 : index
    %66 = tpu.strided_load %arg5[%c2_63, %c0_64] {strides = array<i32: 2, 1>} : memref<40x128xf32, #tpu.memory_space<vmem>>, vector<4x128xf32>
    %67 = arith.truncf %66 : vector<4x128xf32> to vector<4x128xbf16>
    %c0_65 = arith.constant 0 : index
    %c256_66 = arith.constant 256 : index
    %68 = vector.load %arg6[%c0_65, %c256_66] : memref<16x384xbf16, #tpu.memory_space<vmem>>, vector<4x128xbf16>
    tpu.vector_store %arg6[%c0_65, %c256_66], %67 {strides = array<i32>} : memref<16x384xbf16, #tpu.memory_space<vmem>>, vector<4x128xbf16>,
    %c0_67 = arith.constant 0 : index
    %c0_68 = arith.constant 0 : index
    %69 = vector.load %arg6[%c0_67, %c0_68] : memref<16x384xbf16, #tpu.memory_space<vmem>>, vector<4x384xbf16>
    %c672 = arith.constant 672 : index
    %c0_69 = arith.constant 0 : index
    %70 = vector.load %arg2[%c672, %c0_69] : memref<1744x256xbf16, #tpu.memory_space<vmem>>, vector<384x96xbf16>
    %cst_70 = arith.constant dense<0.000000e+00> : vector<4x96xf32>
    %71 = tpu.matmul %69, %70, %cst_70 {dimension_numbers = #tpu.dot_dimension_numbers<[1], [0], [0], [1], [0, 0, 1, 1], [], []>} : vector<4x384xbf16>, vector<384x96xbf16>, vector<4x96xf32> -> vector<4x96xf32>
    %c16 = arith.constant 16 : index
    %c0_71 = arith.constant 0 : index
    %72 = vector.load %arg3[%c16, %c0_71] : memref<112x256xf32, #tpu.memory_space<vmem>>, vector<1x96xf32>
    %73 = vector.broadcast %72 : vector<1x96xf32> to vector<4x96xf32>
    %74 = arith.addf %71, %73 : vector<4x96xf32>
    %75 = arith.negf %74 : vector<4x96xf32>
    %76 = math.exp %75 : vector<4x96xf32>
    %cst_72 = arith.constant 1.000000e+00 : f32
    %77 = vector.broadcast %cst_72 : f32 to vector<4x96xf32>
    %78 = arith.addf %77, %76 : vector<4x96xf32>
    %79 = arith.divf %77, %78 : vector<4x96xf32>
    %80 = arith.mulf %74, %79 : vector<4x96xf32>
    %cst_73 = arith.constant 0.000000e+00 : f32
    %81 = vector.broadcast %cst_73 : f32 to vector<1x96xf32>
    %c0_74 = arith.constant 0 : index
    %c0_75 = arith.constant 0 : index
    %82 = vector.load %arg5[%c0_74, %c0_75] : memref<40x128xf32, #tpu.memory_space<vmem>>, vector<1x96xf32>
    tpu.vector_store %arg5[%c0_74, %c0_75], %81 {strides = array<i32>} : memref<40x128xf32, #tpu.memory_space<vmem>>, vector<1x96xf32>,
    %c5 = arith.constant 5 : index
    %c0_76 = arith.constant 0 : index
    %83 = vector.load %arg5[%c5, %c0_76] : memref<40x128xf32, #tpu.memory_space<vmem>>, vector<1x96xf32>
    tpu.vector_store %arg5[%c5, %c0_76], %81 {strides = array<i32>} : memref<40x128xf32, #tpu.memory_space<vmem>>, vector<1x96xf32>,
    %c1_77 = arith.constant 1 : index
    %c0_78 = arith.constant 0 : index
    %84 = vector.load %arg5[%c1_77, %c0_78] : memref<40x128xf32, #tpu.memory_space<vmem>>, vector<4x96xf32>
    tpu.vector_store %arg5[%c1_77, %c0_78], %80 {strides = array<i32>} : memref<40x128xf32, #tpu.memory_space<vmem>>, vector<4x96xf32>,
    %c0_79 = arith.constant 0 : index
    %c0_80 = arith.constant 0 : index
    %85 = tpu.strided_load %arg5[%c0_79, %c0_80] {strides = array<i32: 2, 1>} : memref<40x128xf32, #tpu.memory_space<vmem>>, vector<2x96xf32>
    %86 = arith.truncf %85 : vector<2x96xf32> to vector<2x96xbf16>
    %c0_81 = arith.constant 0 : index
    %c0_82 = arith.constant 0 : index
    %87 = vector.load %arg6[%c0_81, %c0_82] : memref<16x384xbf16, #tpu.memory_space<vmem>>, vector<2x96xbf16>
    tpu.vector_store %arg6[%c0_81, %c0_82], %86 {strides = array<i32>} : memref<16x384xbf16, #tpu.memory_space<vmem>>, vector<2x96xbf16>,
    %c1_83 = arith.constant 1 : index
    %c0_84 = arith.constant 0 : index
    %88 = tpu.strided_load %arg5[%c1_83, %c0_84] {strides = array<i32: 2, 1>} : memref<40x128xf32, #tpu.memory_space<vmem>>, vector<2x96xf32>
    %89 = arith.truncf %88 : vector<2x96xf32> to vector<2x96xbf16>
    %c0_85 = arith.constant 0 : index
    %c96_86 = arith.constant 96 : index
    %90 = vector.load %arg6[%c0_85, %c96_86] : memref<16x384xbf16, #tpu.memory_space<vmem>>, vector<2x96xbf16>
    tpu.vector_store %arg6[%c0_85, %c96_86], %89 {strides = array<i32>} : memref<16x384xbf16, #tpu.memory_space<vmem>>, vector<2x96xbf16>,
    %c2_87 = arith.constant 2 : index
    %c0_88 = arith.constant 0 : index
    %91 = tpu.strided_load %arg5[%c2_87, %c0_88] {strides = array<i32: 2, 1>} : memref<40x128xf32, #tpu.memory_space<vmem>>, vector<2x96xf32>
    %92 = arith.truncf %91 : vector<2x96xf32> to vector<2x96xbf16>
    %c0_89 = arith.constant 0 : index
    %c192_90 = arith.constant 192 : index
    %93 = vector.load %arg6[%c0_89, %c192_90] : memref<16x384xbf16, #tpu.memory_space<vmem>>, vector<2x96xbf16>
    tpu.vector_store %arg6[%c0_89, %c192_90], %92 {strides = array<i32>} : memref<16x384xbf16, #tpu.memory_space<vmem>>, vector<2x96xbf16>,
    %c0_91 = arith.constant 0 : index
    %c0_92 = arith.constant 0 : index
    %94 = vector.load %arg6[%c0_91, %c0_92] : memref<16x384xbf16, #tpu.memory_space<vmem>>, vector<2x288xbf16>
    %c1056 = arith.constant 1056 : index
    %c0_93 = arith.constant 0 : index
    %95 = vector.load %arg2[%c1056, %c0_93] : memref<1744x256xbf16, #tpu.memory_space<vmem>>, vector<288x64xbf16>
    %cst_94 = arith.constant dense<0.000000e+00> : vector<2x64xf32>
    %96 = tpu.matmul %94, %95, %cst_94 {dimension_numbers = #tpu.dot_dimension_numbers<[1], [0], [0], [1], [0, 0, 1, 1], [], []>} : vector<2x288xbf16>, vector<288x64xbf16>, vector<2x64xf32> -> vector<2x64xf32>
    %c24 = arith.constant 24 : index
    %c0_95 = arith.constant 0 : index
    %97 = vector.load %arg3[%c24, %c0_95] : memref<112x256xf32, #tpu.memory_space<vmem>>, vector<1x64xf32>
    %98 = vector.broadcast %97 : vector<1x64xf32> to vector<2x64xf32>
    %99 = arith.addf %96, %98 : vector<2x64xf32>
    %100 = arith.negf %99 : vector<2x64xf32>
    %101 = math.exp %100 : vector<2x64xf32>
    %cst_96 = arith.constant 1.000000e+00 : f32
    %102 = vector.broadcast %cst_96 : f32 to vector<2x64xf32>
    %103 = arith.addf %102, %101 : vector<2x64xf32>
    %104 = arith.divf %102, %103 : vector<2x64xf32>
    %105 = arith.mulf %99, %104 : vector<2x64xf32>
    %cst_97 = arith.constant 0.000000e+00 : f32
    %106 = vector.broadcast %cst_97 : f32 to vector<1x64xf32>
    %c0_98 = arith.constant 0 : index
    %c0_99 = arith.constant 0 : index
    %107 = vector.load %arg5[%c0_98, %c0_99] : memref<40x128xf32, #tpu.memory_space<vmem>>, vector<1x64xf32>
    tpu.vector_store %arg5[%c0_98, %c0_99], %106 {strides = array<i32>} : memref<40x128xf32, #tpu.memory_space<vmem>>, vector<1x64xf32>,
    %c3 = arith.constant 3 : index
    %c0_100 = arith.constant 0 : index
    %108 = vector.load %arg5[%c3, %c0_100] : memref<40x128xf32, #tpu.memory_space<vmem>>, vector<1x64xf32>
    tpu.vector_store %arg5[%c3, %c0_100], %106 {strides = array<i32>} : memref<40x128xf32, #tpu.memory_space<vmem>>, vector<1x64xf32>,
    %c1_101 = arith.constant 1 : index
    %c0_102 = arith.constant 0 : index
    %109 = vector.load %arg5[%c1_101, %c0_102] : memref<40x128xf32, #tpu.memory_space<vmem>>, vector<2x64xf32>
    tpu.vector_store %arg5[%c1_101, %c0_102], %105 {strides = array<i32>} : memref<40x128xf32, #tpu.memory_space<vmem>>, vector<2x64xf32>,
    %c0_103 = arith.constant 0 : index
    %c0_104 = arith.constant 0 : index
    %110 = tpu.strided_load %arg5[%c0_103, %c0_104] {strides = array<i32: 2, 1>} : memref<40x128xf32, #tpu.memory_space<vmem>>, vector<1x64xf32>
    %111 = arith.truncf %110 : vector<1x64xf32> to vector<1x64xbf16>
    %c0_105 = arith.constant 0 : index
    %c0_106 = arith.constant 0 : index
    %112 = vector.load %arg6[%c0_105, %c0_106] : memref<16x384xbf16, #tpu.memory_space<vmem>>, vector<1x64xbf16>
    tpu.vector_store %arg6[%c0_105, %c0_106], %111 {strides = array<i32>} : memref<16x384xbf16, #tpu.memory_space<vmem>>, vector<1x64xbf16>,
    %c1_107 = arith.constant 1 : index
    %c0_108 = arith.constant 0 : index
    %113 = tpu.strided_load %arg5[%c1_107, %c0_108] {strides = array<i32: 2, 1>} : memref<40x128xf32, #tpu.memory_space<vmem>>, vector<1x64xf32>
    %114 = arith.truncf %113 : vector<1x64xf32> to vector<1x64xbf16>
    %c0_109 = arith.constant 0 : index
    %c64 = arith.constant 64 : index
    %115 = vector.load %arg6[%c0_109, %c64] : memref<16x384xbf16, #tpu.memory_space<vmem>>, vector<1x64xbf16>
    tpu.vector_store %arg6[%c0_109, %c64], %114 {strides = array<i32>} : memref<16x384xbf16, #tpu.memory_space<vmem>>, vector<1x64xbf16>,
    %c2_110 = arith.constant 2 : index
    %c0_111 = arith.constant 0 : index
    %116 = tpu.strided_load %arg5[%c2_110, %c0_111] {strides = array<i32: 2, 1>} : memref<40x128xf32, #tpu.memory_space<vmem>>, vector<1x64xf32>
    %117 = arith.truncf %116 : vector<1x64xf32> to vector<1x64xbf16>
    %c0_112 = arith.constant 0 : index
    %c128_113 = arith.constant 128 : index
    %118 = vector.load %arg6[%c0_112, %c128_113] : memref<16x384xbf16, #tpu.memory_space<vmem>>, vector<1x64xbf16>
    tpu.vector_store %arg6[%c0_112, %c128_113], %117 {strides = array<i32>} : memref<16x384xbf16, #tpu.memory_space<vmem>>, vector<1x64xbf16>,
    %c0_114 = arith.constant 0 : index
    %c0_115 = arith.constant 0 : index
    %119 = vector.load %arg6[%c0_114, %c0_115] : memref<16x384xbf16, #tpu.memory_space<vmem>>, vector<1x192xbf16>
    %c1344 = arith.constant 1344 : index
    %c0_116 = arith.constant 0 : index
    %120 = vector.load %arg2[%c1344, %c0_116] : memref<1744x256xbf16, #tpu.memory_space<vmem>>, vector<192x48xbf16>
    %cst_117 = arith.constant dense<0.000000e+00> : vector<1x48xf32>
    %121 = tpu.matmul %119, %120, %cst_117 {dimension_numbers = #tpu.dot_dimension_numbers<[1], [0], [0], [1], [0, 0, 1, 1], [], []>} : vector<1x192xbf16>, vector<192x48xbf16>, vector<1x48xf32> -> vector<1x48xf32>
    %c32 = arith.constant 32 : index
    %c0_118 = arith.constant 0 : index
    %122 = vector.load %arg3[%c32, %c0_118] : memref<112x256xf32, #tpu.memory_space<vmem>>, vector<1x48xf32>
    %123 = arith.addf %121, %122 : vector<1x48xf32>
    %124 = arith.negf %123 : vector<1x48xf32>
    %125 = math.exp %124 : vector<1x48xf32>
    %cst_119 = arith.constant 1.000000e+00 : f32
    %126 = vector.broadcast %cst_119 : f32 to vector<1x48xf32>
    %127 = arith.addf %126, %125 : vector<1x48xf32>
    %128 = arith.divf %126, %127 : vector<1x48xf32>
    %129 = arith.mulf %123, %128 : vector<1x48xf32>
    %130 = arith.truncf %80 : vector<4x96xf32> to vector<4x96xbf16>
    %c1536 = arith.constant 1536 : index
    %c0_120 = arith.constant 0 : index
    %131 = vector.load %arg2[%c1536, %c0_120] : memref<1744x256xbf16, #tpu.memory_space<vmem>>, vector<96x192xbf16>
    %cst_121 = arith.constant dense<0.000000e+00> : vector<4x192xf32>
    %132 = tpu.matmul %130, %131, %cst_121 {dimension_numbers = #tpu.dot_dimension_numbers<[1], [0], [0], [1], [0, 0, 1, 1], [], []>} : vector<4x96xbf16>, vector<96x192xbf16>, vector<4x192xf32> -> vector<4x192xf32>
    %c40 = arith.constant 40 : index
    %c0_122 = arith.constant 0 : index
    %133 = vector.load %arg3[%c40, %c0_122] : memref<112x256xf32, #tpu.memory_space<vmem>>, vector<1x192xf32>
    %134 = vector.broadcast %133 : vector<1x192xf32> to vector<4x192xf32>
    %135 = arith.addf %132, %134 : vector<4x192xf32>
    %136 = vector.extract_strided_slice %135 {offsets = [0, 0], sizes = [4, 64], strides = [1, 1]} : vector<4x192xf32> to vector<4x64xf32>
    %137 = vector.extract_strided_slice %135 {offsets = [0, 64], sizes = [4, 16], strides = [1, 1]} : vector<4x192xf32> to vector<4x16xf32>
    %138 = vector.extract_strided_slice %135 {offsets = [0, 80], sizes = [4, 16], strides = [1, 1]} : vector<4x192xf32> to vector<4x16xf32>
    %139 = vector.extract_strided_slice %135 {offsets = [0, 96], sizes = [4, 16], strides = [1, 1]} : vector<4x192xf32> to vector<4x16xf32>
    %140 = vector.extract_strided_slice %135 {offsets = [0, 112], sizes = [4, 16], strides = [1, 1]} : vector<4x192xf32> to vector<4x16xf32>
    %141 = vector.extract_strided_slice %135 {offsets = [0, 128], sizes = [4, 16], strides = [1, 1]} : vector<4x192xf32> to vector<4x16xf32>
    %142 = vector.extract_strided_slice %135 {offsets = [0, 144], sizes = [4, 16], strides = [1, 1]} : vector<4x192xf32> to vector<4x16xf32>
    %143 = vector.extract_strided_slice %135 {offsets = [0, 160], sizes = [4, 16], strides = [1, 1]} : vector<4x192xf32> to vector<4x16xf32>
    %144 = vector.extract_strided_slice %135 {offsets = [0, 176], sizes = [4, 16], strides = [1, 1]} : vector<4x192xf32> to vector<4x16xf32>
    %145 = arith.maximumf %137, %138 : vector<4x16xf32>
    %146 = arith.maximumf %145, %139 : vector<4x16xf32>
    %147 = arith.maximumf %146, %140 : vector<4x16xf32>
    %148 = arith.maximumf %147, %141 : vector<4x16xf32>
    %149 = arith.maximumf %148, %142 : vector<4x16xf32>
    %150 = arith.maximumf %149, %143 : vector<4x16xf32>
    %151 = arith.maximumf %150, %144 : vector<4x16xf32>
    %cst_123 = arith.constant 0.000000e+00 : f32
    %152 = vector.broadcast %cst_123 : f32 to vector<4x16xf32>
    %cst_124 = arith.constant 0.000000e+00 : f32
    %153 = vector.broadcast %cst_124 : f32 to vector<4x16xf32>
    %154 = arith.subf %137, %151 : vector<4x16xf32>
    %155 = math.exp %154 : vector<4x16xf32>
    %156 = arith.addf %152, %155 : vector<4x16xf32>
    %157 = arith.subf %138, %151 : vector<4x16xf32>
    %158 = math.exp %157 : vector<4x16xf32>
    %159 = arith.addf %156, %158 : vector<4x16xf32>
    %cst_125 = arith.constant 1.000000e+00 : f32
    %160 = vector.broadcast %cst_125 : f32 to vector<4x16xf32>
    %161 = arith.mulf %160, %158 : vector<4x16xf32>
    %162 = arith.addf %153, %161 : vector<4x16xf32>
    %163 = arith.subf %139, %151 : vector<4x16xf32>
    %164 = math.exp %163 : vector<4x16xf32>
    %165 = arith.addf %159, %164 : vector<4x16xf32>
    %cst_126 = arith.constant 2.000000e+00 : f32
    %166 = vector.broadcast %cst_126 : f32 to vector<4x16xf32>
    %167 = arith.mulf %166, %164 : vector<4x16xf32>
    %168 = arith.addf %162, %167 : vector<4x16xf32>
    %169 = arith.subf %140, %151 : vector<4x16xf32>
    %170 = math.exp %169 : vector<4x16xf32>
    %171 = arith.addf %165, %170 : vector<4x16xf32>
    %cst_127 = arith.constant 3.000000e+00 : f32
    %172 = vector.broadcast %cst_127 : f32 to vector<4x16xf32>
    %173 = arith.mulf %172, %170 : vector<4x16xf32>
    %174 = arith.addf %168, %173 : vector<4x16xf32>
    %175 = arith.subf %141, %151 : vector<4x16xf32>
    %176 = math.exp %175 : vector<4x16xf32>
    %177 = arith.addf %171, %176 : vector<4x16xf32>
    %cst_128 = arith.constant 4.000000e+00 : f32
    %178 = vector.broadcast %cst_128 : f32 to vector<4x16xf32>
    %179 = arith.mulf %178, %176 : vector<4x16xf32>
    %180 = arith.addf %174, %179 : vector<4x16xf32>
    %181 = arith.subf %142, %151 : vector<4x16xf32>
    %182 = math.exp %181 : vector<4x16xf32>
    %183 = arith.addf %177, %182 : vector<4x16xf32>
    %cst_129 = arith.constant 5.000000e+00 : f32
    %184 = vector.broadcast %cst_129 : f32 to vector<4x16xf32>
    %185 = arith.mulf %184, %182 : vector<4x16xf32>
    %186 = arith.addf %180, %185 : vector<4x16xf32>
    %187 = arith.subf %143, %151 : vector<4x16xf32>
    %188 = math.exp %187 : vector<4x16xf32>
    %189 = arith.addf %183, %188 : vector<4x16xf32>
    %cst_130 = arith.constant 6.000000e+00 : f32
    %190 = vector.broadcast %cst_130 : f32 to vector<4x16xf32>
    %191 = arith.mulf %190, %188 : vector<4x16xf32>
    %192 = arith.addf %186, %191 : vector<4x16xf32>
    %193 = arith.subf %144, %151 : vector<4x16xf32>
    %194 = math.exp %193 : vector<4x16xf32>
    %195 = arith.addf %189, %194 : vector<4x16xf32>
    %cst_131 = arith.constant 7.000000e+00 : f32
    %196 = vector.broadcast %cst_131 : f32 to vector<4x16xf32>
    %197 = arith.mulf %196, %194 : vector<4x16xf32>
    %198 = arith.addf %192, %197 : vector<4x16xf32>
    %199 = arith.divf %198, %195 : vector<4x16xf32>
    %c64_132 = arith.constant 64 : index
    %c0_133 = arith.constant 0 : index
    %200 = vector.load %arg3[%c64_132, %c0_133] : memref<112x256xf32, #tpu.memory_space<vmem>>, vector<1x16xf32>
    %c88 = arith.constant 88 : index
    %c0_134 = arith.constant 0 : index
    %201 = vector.load %arg3[%c88, %c0_134] : memref<112x256xf32, #tpu.memory_space<vmem>>, vector<4x16xf32>
    %202 = vector.broadcast %200 : vector<1x16xf32> to vector<4x16xf32>
    %203 = arith.mulf %199, %202 : vector<4x16xf32>
    %204 = arith.addf %201, %203 : vector<4x16xf32>
    %c0_135 = arith.constant 0 : index
    %c0_136 = arith.constant 0 : index
    %c0_137 = arith.constant 0 : index
    %205 = vector.load %arg4[%c0_135, %c0_136, %c0_137] : memref<1x8x128xf32, #tpu.memory_space<vmem>>, vector<1x4x64xf32>
    %206 = vector.shape_cast %205 : vector<1x4x64xf32> to vector<4x64xf32>
    %207 = vector.shape_cast %136 : vector<4x64xf32> to vector<1x4x64xf32>
    tpu.vector_store %arg4[%c0_135, %c0_136, %c0_137], %207 {strides = array<i32>} : memref<1x8x128xf32, #tpu.memory_space<vmem>>, vector<1x4x64xf32>,
    %c0_138 = arith.constant 0 : index
    %c0_139 = arith.constant 0 : index
    %c64_140 = arith.constant 64 : index
    %208 = vector.load %arg4[%c0_138, %c0_139, %c64_140] : memref<1x8x128xf32, #tpu.memory_space<vmem>>, vector<1x4x16xf32>
    %209 = vector.shape_cast %208 : vector<1x4x16xf32> to vector<4x16xf32>
    %210 = vector.shape_cast %204 : vector<4x16xf32> to vector<1x4x16xf32>
    tpu.vector_store %arg4[%c0_138, %c0_139, %c64_140], %210 {strides = array<i32>} : memref<1x8x128xf32, #tpu.memory_space<vmem>>, vector<1x4x16xf32>,
    %211 = arith.truncf %105 : vector<2x64xf32> to vector<2x64xbf16>
    %c1632 = arith.constant 1632 : index
    %c0_141 = arith.constant 0 : index
    %212 = vector.load %arg2[%c1632, %c0_141] : memref<1744x256xbf16, #tpu.memory_space<vmem>>, vector<64x96xbf16>
    %cst_142 = arith.constant dense<0.000000e+00> : vector<2x96xf32>
    %213 = tpu.matmul %211, %212, %cst_142 {dimension_numbers = #tpu.dot_dimension_numbers<[1], [0], [0], [1], [0, 0, 1, 1], [], []>} : vector<2x64xbf16>, vector<64x96xbf16>, vector<2x96xf32> -> vector<2x96xf32>
    %c48 = arith.constant 48 : index
    %c0_143 = arith.constant 0 : index
    %214 = vector.load %arg3[%c48, %c0_143] : memref<112x256xf32, #tpu.memory_space<vmem>>, vector<1x96xf32>
    %215 = vector.broadcast %214 : vector<1x96xf32> to vector<2x96xf32>
    %216 = arith.addf %213, %215 : vector<2x96xf32>
    %217 = vector.extract_strided_slice %216 {offsets = [0, 0], sizes = [2, 32], strides = [1, 1]} : vector<2x96xf32> to vector<2x32xf32>
    %218 = vector.extract_strided_slice %216 {offsets = [0, 32], sizes = [2, 8], strides = [1, 1]} : vector<2x96xf32> to vector<2x8xf32>
    %219 = vector.extract_strided_slice %216 {offsets = [0, 40], sizes = [2, 8], strides = [1, 1]} : vector<2x96xf32> to vector<2x8xf32>
    %220 = vector.extract_strided_slice %216 {offsets = [0, 48], sizes = [2, 8], strides = [1, 1]} : vector<2x96xf32> to vector<2x8xf32>
    %221 = vector.extract_strided_slice %216 {offsets = [0, 56], sizes = [2, 8], strides = [1, 1]} : vector<2x96xf32> to vector<2x8xf32>
    %222 = vector.extract_strided_slice %216 {offsets = [0, 64], sizes = [2, 8], strides = [1, 1]} : vector<2x96xf32> to vector<2x8xf32>
    %223 = vector.extract_strided_slice %216 {offsets = [0, 72], sizes = [2, 8], strides = [1, 1]} : vector<2x96xf32> to vector<2x8xf32>
    %224 = vector.extract_strided_slice %216 {offsets = [0, 80], sizes = [2, 8], strides = [1, 1]} : vector<2x96xf32> to vector<2x8xf32>
    %225 = vector.extract_strided_slice %216 {offsets = [0, 88], sizes = [2, 8], strides = [1, 1]} : vector<2x96xf32> to vector<2x8xf32>
    %226 = arith.maximumf %218, %219 : vector<2x8xf32>
    %227 = arith.maximumf %226, %220 : vector<2x8xf32>
    %228 = arith.maximumf %227, %221 : vector<2x8xf32>
    %229 = arith.maximumf %228, %222 : vector<2x8xf32>
    %230 = arith.maximumf %229, %223 : vector<2x8xf32>
    %231 = arith.maximumf %230, %224 : vector<2x8xf32>
    %232 = arith.maximumf %231, %225 : vector<2x8xf32>
    %cst_144 = arith.constant 0.000000e+00 : f32
    %233 = vector.broadcast %cst_144 : f32 to vector<2x8xf32>
    %cst_145 = arith.constant 0.000000e+00 : f32
    %234 = vector.broadcast %cst_145 : f32 to vector<2x8xf32>
    %235 = arith.subf %218, %232 : vector<2x8xf32>
    %236 = math.exp %235 : vector<2x8xf32>
    %237 = arith.addf %233, %236 : vector<2x8xf32>
    %238 = arith.subf %219, %232 : vector<2x8xf32>
    %239 = math.exp %238 : vector<2x8xf32>
    %240 = arith.addf %237, %239 : vector<2x8xf32>
    %cst_146 = arith.constant 1.000000e+00 : f32
    %241 = vector.broadcast %cst_146 : f32 to vector<2x8xf32>
    %242 = arith.mulf %241, %239 : vector<2x8xf32>
    %243 = arith.addf %234, %242 : vector<2x8xf32>
    %244 = arith.subf %220, %232 : vector<2x8xf32>
    %245 = math.exp %244 : vector<2x8xf32>
    %246 = arith.addf %240, %245 : vector<2x8xf32>
    %cst_147 = arith.constant 2.000000e+00 : f32
    %247 = vector.broadcast %cst_147 : f32 to vector<2x8xf32>
    %248 = arith.mulf %247, %245 : vector<2x8xf32>
    %249 = arith.addf %243, %248 : vector<2x8xf32>
    %250 = arith.subf %221, %232 : vector<2x8xf32>
    %251 = math.exp %250 : vector<2x8xf32>
    %252 = arith.addf %246, %251 : vector<2x8xf32>
    %cst_148 = arith.constant 3.000000e+00 : f32
    %253 = vector.broadcast %cst_148 : f32 to vector<2x8xf32>
    %254 = arith.mulf %253, %251 : vector<2x8xf32>
    %255 = arith.addf %249, %254 : vector<2x8xf32>
    %256 = arith.subf %222, %232 : vector<2x8xf32>
    %257 = math.exp %256 : vector<2x8xf32>
    %258 = arith.addf %252, %257 : vector<2x8xf32>
    %cst_149 = arith.constant 4.000000e+00 : f32
    %259 = vector.broadcast %cst_149 : f32 to vector<2x8xf32>
    %260 = arith.mulf %259, %257 : vector<2x8xf32>
    %261 = arith.addf %255, %260 : vector<2x8xf32>
    %262 = arith.subf %223, %232 : vector<2x8xf32>
    %263 = math.exp %262 : vector<2x8xf32>
    %264 = arith.addf %258, %263 : vector<2x8xf32>
    %cst_150 = arith.constant 5.000000e+00 : f32
    %265 = vector.broadcast %cst_150 : f32 to vector<2x8xf32>
    %266 = arith.mulf %265, %263 : vector<2x8xf32>
    %267 = arith.addf %261, %266 : vector<2x8xf32>
    %268 = arith.subf %224, %232 : vector<2x8xf32>
    %269 = math.exp %268 : vector<2x8xf32>
    %270 = arith.addf %264, %269 : vector<2x8xf32>
    %cst_151 = arith.constant 6.000000e+00 : f32
    %271 = vector.broadcast %cst_151 : f32 to vector<2x8xf32>
    %272 = arith.mulf %271, %269 : vector<2x8xf32>
    %273 = arith.addf %267, %272 : vector<2x8xf32>
    %274 = arith.subf %225, %232 : vector<2x8xf32>
    %275 = math.exp %274 : vector<2x8xf32>
    %276 = arith.addf %270, %275 : vector<2x8xf32>
    %cst_152 = arith.constant 7.000000e+00 : f32
    %277 = vector.broadcast %cst_152 : f32 to vector<2x8xf32>
    %278 = arith.mulf %277, %275 : vector<2x8xf32>
    %279 = arith.addf %273, %278 : vector<2x8xf32>
    %280 = arith.divf %279, %276 : vector<2x8xf32>
    %c72 = arith.constant 72 : index
    %c0_153 = arith.constant 0 : index
    %281 = vector.load %arg3[%c72, %c0_153] : memref<112x256xf32, #tpu.memory_space<vmem>>, vector<1x8xf32>
    %c96_154 = arith.constant 96 : index
    %c0_155 = arith.constant 0 : index
    %282 = vector.load %arg3[%c96_154, %c0_155] : memref<112x256xf32, #tpu.memory_space<vmem>>, vector<2x8xf32>
    %283 = vector.broadcast %281 : vector<1x8xf32> to vector<2x8xf32>
    %284 = arith.mulf %280, %283 : vector<2x8xf32>
    %285 = arith.addf %282, %284 : vector<2x8xf32>
    %c0_156 = arith.constant 0 : index
    %c4 = arith.constant 4 : index
    %c0_157 = arith.constant 0 : index
    %286 = vector.load %arg4[%c0_156, %c4, %c0_157] : memref<1x8x128xf32, #tpu.memory_space<vmem>>, vector<1x2x32xf32>
    %287 = vector.shape_cast %286 : vector<1x2x32xf32> to vector<2x32xf32>
    %288 = vector.shape_cast %217 : vector<2x32xf32> to vector<1x2x32xf32>
    tpu.vector_store %arg4[%c0_156, %c4, %c0_157], %288 {strides = array<i32>} : memref<1x8x128xf32, #tpu.memory_space<vmem>>, vector<1x2x32xf32>,
    %c0_158 = arith.constant 0 : index
    %c4_159 = arith.constant 4 : index
    %c32_160 = arith.constant 32 : index
    %289 = vector.load %arg4[%c0_158, %c4_159, %c32_160] : memref<1x8x128xf32, #tpu.memory_space<vmem>>, vector<1x2x8xf32>
    %290 = vector.shape_cast %289 : vector<1x2x8xf32> to vector<2x8xf32>
    %291 = vector.shape_cast %285 : vector<2x8xf32> to vector<1x2x8xf32>
    tpu.vector_store %arg4[%c0_158, %c4_159, %c32_160], %291 {strides = array<i32>} : memref<1x8x128xf32, #tpu.memory_space<vmem>>, vector<1x2x8xf32>,
    %292 = arith.truncf %129 : vector<1x48xf32> to vector<1x48xbf16>
    %c1696 = arith.constant 1696 : index
    %c0_161 = arith.constant 0 : index
    %293 = vector.load %arg2[%c1696, %c0_161] : memref<1744x256xbf16, #tpu.memory_space<vmem>>, vector<48x48xbf16>
    %cst_162 = arith.constant dense<0.000000e+00> : vector<1x48xf32>
    %294 = tpu.matmul %292, %293, %cst_162 {dimension_numbers = #tpu.dot_dimension_numbers<[1], [0], [0], [1], [0, 0, 1, 1], [], []>} : vector<1x48xbf16>, vector<48x48xbf16>, vector<1x48xf32> -> vector<1x48xf32>
    %c56 = arith.constant 56 : index
    %c0_163 = arith.constant 0 : index
    %295 = vector.load %arg3[%c56, %c0_163] : memref<112x256xf32, #tpu.memory_space<vmem>>, vector<1x48xf32>
    %296 = arith.addf %294, %295 : vector<1x48xf32>
    %297 = vector.extract_strided_slice %296 {offsets = [0, 0], sizes = [1, 16], strides = [1, 1]} : vector<1x48xf32> to vector<1x16xf32>
    %298 = vector.extract_strided_slice %296 {offsets = [0, 16], sizes = [1, 4], strides = [1, 1]} : vector<1x48xf32> to vector<1x4xf32>
    %299 = vector.extract_strided_slice %296 {offsets = [0, 20], sizes = [1, 4], strides = [1, 1]} : vector<1x48xf32> to vector<1x4xf32>
    %300 = vector.extract_strided_slice %296 {offsets = [0, 24], sizes = [1, 4], strides = [1, 1]} : vector<1x48xf32> to vector<1x4xf32>
    %301 = vector.extract_strided_slice %296 {offsets = [0, 28], sizes = [1, 4], strides = [1, 1]} : vector<1x48xf32> to vector<1x4xf32>
    %302 = vector.extract_strided_slice %296 {offsets = [0, 32], sizes = [1, 4], strides = [1, 1]} : vector<1x48xf32> to vector<1x4xf32>
    %303 = vector.extract_strided_slice %296 {offsets = [0, 36], sizes = [1, 4], strides = [1, 1]} : vector<1x48xf32> to vector<1x4xf32>
    %304 = vector.extract_strided_slice %296 {offsets = [0, 40], sizes = [1, 4], strides = [1, 1]} : vector<1x48xf32> to vector<1x4xf32>
    %305 = vector.extract_strided_slice %296 {offsets = [0, 44], sizes = [1, 4], strides = [1, 1]} : vector<1x48xf32> to vector<1x4xf32>
    %306 = arith.maximumf %298, %299 : vector<1x4xf32>
    %307 = arith.maximumf %306, %300 : vector<1x4xf32>
    %308 = arith.maximumf %307, %301 : vector<1x4xf32>
    %309 = arith.maximumf %308, %302 : vector<1x4xf32>
    %310 = arith.maximumf %309, %303 : vector<1x4xf32>
    %311 = arith.maximumf %310, %304 : vector<1x4xf32>
    %312 = arith.maximumf %311, %305 : vector<1x4xf32>
    %cst_164 = arith.constant 0.000000e+00 : f32
    %313 = vector.broadcast %cst_164 : f32 to vector<1x4xf32>
    %cst_165 = arith.constant 0.000000e+00 : f32
    %314 = vector.broadcast %cst_165 : f32 to vector<1x4xf32>
    %315 = arith.subf %298, %312 : vector<1x4xf32>
    %316 = math.exp %315 : vector<1x4xf32>
    %317 = arith.addf %313, %316 : vector<1x4xf32>
    %318 = arith.subf %299, %312 : vector<1x4xf32>
    %319 = math.exp %318 : vector<1x4xf32>
    %320 = arith.addf %317, %319 : vector<1x4xf32>
    %cst_166 = arith.constant 1.000000e+00 : f32
    %321 = vector.broadcast %cst_166 : f32 to vector<1x4xf32>
    %322 = arith.mulf %321, %319 : vector<1x4xf32>
    %323 = arith.addf %314, %322 : vector<1x4xf32>
    %324 = arith.subf %300, %312 : vector<1x4xf32>
    %325 = math.exp %324 : vector<1x4xf32>
    %326 = arith.addf %320, %325 : vector<1x4xf32>
    %cst_167 = arith.constant 2.000000e+00 : f32
    %327 = vector.broadcast %cst_167 : f32 to vector<1x4xf32>
    %328 = arith.mulf %327, %325 : vector<1x4xf32>
    %329 = arith.addf %323, %328 : vector<1x4xf32>
    %330 = arith.subf %301, %312 : vector<1x4xf32>
    %331 = math.exp %330 : vector<1x4xf32>
    %332 = arith.addf %326, %331 : vector<1x4xf32>
    %cst_168 = arith.constant 3.000000e+00 : f32
    %333 = vector.broadcast %cst_168 : f32 to vector<1x4xf32>
    %334 = arith.mulf %333, %331 : vector<1x4xf32>
    %335 = arith.addf %329, %334 : vector<1x4xf32>
    %336 = arith.subf %302, %312 : vector<1x4xf32>
    %337 = math.exp %336 : vector<1x4xf32>
    %338 = arith.addf %332, %337 : vector<1x4xf32>
    %cst_169 = arith.constant 4.000000e+00 : f32
    %339 = vector.broadcast %cst_169 : f32 to vector<1x4xf32>
    %340 = arith.mulf %339, %337 : vector<1x4xf32>
    %341 = arith.addf %335, %340 : vector<1x4xf32>
    %342 = arith.subf %303, %312 : vector<1x4xf32>
    %343 = math.exp %342 : vector<1x4xf32>
    %344 = arith.addf %338, %343 : vector<1x4xf32>
    %cst_170 = arith.constant 5.000000e+00 : f32
    %345 = vector.broadcast %cst_170 : f32 to vector<1x4xf32>
    %346 = arith.mulf %345, %343 : vector<1x4xf32>
    %347 = arith.addf %341, %346 : vector<1x4xf32>
    %348 = arith.subf %304, %312 : vector<1x4xf32>
    %349 = math.exp %348 : vector<1x4xf32>
    %350 = arith.addf %344, %349 : vector<1x4xf32>
    %cst_171 = arith.constant 6.000000e+00 : f32
    %351 = vector.broadcast %cst_171 : f32 to vector<1x4xf32>
    %352 = arith.mulf %351, %349 : vector<1x4xf32>
    %353 = arith.addf %347, %352 : vector<1x4xf32>
    %354 = arith.subf %305, %312 : vector<1x4xf32>
    %355 = math.exp %354 : vector<1x4xf32>
    %356 = arith.addf %350, %355 : vector<1x4xf32>
    %cst_172 = arith.constant 7.000000e+00 : f32
    %357 = vector.broadcast %cst_172 : f32 to vector<1x4xf32>
    %358 = arith.mulf %357, %355 : vector<1x4xf32>
    %359 = arith.addf %353, %358 : vector<1x4xf32>
    %360 = arith.divf %359, %356 : vector<1x4xf32>
    %c80 = arith.constant 80 : index
    %c0_173 = arith.constant 0 : index
    %361 = vector.load %arg3[%c80, %c0_173] : memref<112x256xf32, #tpu.memory_space<vmem>>, vector<1x4xf32>
    %c104 = arith.constant 104 : index
    %c0_174 = arith.constant 0 : index
    %362 = vector.load %arg3[%c104, %c0_174] : memref<112x256xf32, #tpu.memory_space<vmem>>, vector<1x4xf32>
    %363 = arith.mulf %360, %361 : vector<1x4xf32>
    %364 = arith.addf %362, %363 : vector<1x4xf32>
    %c0_175 = arith.constant 0 : index
    %c6 = arith.constant 6 : index
    %c0_176 = arith.constant 0 : index
    %365 = vector.load %arg4[%c0_175, %c6, %c0_176] : memref<1x8x128xf32, #tpu.memory_space<vmem>>, vector<1x1x16xf32>
    %366 = vector.shape_cast %365 : vector<1x1x16xf32> to vector<1x16xf32>
    %367 = vector.shape_cast %297 : vector<1x16xf32> to vector<1x1x16xf32>
    tpu.vector_store %arg4[%c0_175, %c6, %c0_176], %367 {strides = array<i32>} : memref<1x8x128xf32, #tpu.memory_space<vmem>>, vector<1x1x16xf32>,
    %c0_177 = arith.constant 0 : index
    %c6_178 = arith.constant 6 : index
    %c16_179 = arith.constant 16 : index
    %368 = vector.load %arg4[%c0_177, %c6_178, %c16_179] : memref<1x8x128xf32, #tpu.memory_space<vmem>>, vector<1x1x4xf32>
    %369 = vector.shape_cast %368 : vector<1x1x4xf32> to vector<1x4xf32>
    %370 = vector.shape_cast %364 : vector<1x4xf32> to vector<1x1x4xf32>
    tpu.vector_store %arg4[%c0_177, %c6_178, %c16_179], %370 {strides = array<i32>} : memref<1x8x128xf32, #tpu.memory_space<vmem>>, vector<1x1x4xf32>,
    return
  }
  func.func @transform_0(%arg0: i32) -> (i32, i32, i32) {
    %c0_i32 = arith.constant 0 : i32
    %c0_i32_0 = arith.constant 0 : i32
    %c0_i32_1 = arith.constant 0 : i32
    return %arg0, %c0_i32, %c0_i32_0 : i32, i32, i32
  }
  func.func @transform_1(%arg0: i32) -> (i32, i32) {
    %c0_i32 = arith.constant 0 : i32
    %c0_i32_0 = arith.constant 0 : i32
    %c0_i32_1 = arith.constant 0 : i32
    return %c0_i32, %c0_i32_0 : i32, i32
  }
  func.func @transform_2(%arg0: i32) -> (i32, i32) {
    %c0_i32 = arith.constant 0 : i32
    %c0_i32_0 = arith.constant 0 : i32
    %c0_i32_1 = arith.constant 0 : i32
    return %c0_i32, %c0_i32_0 : i32, i32
  }
  func.func @transform_3(%arg0: i32) -> (i32, i32, i32) {
    %c0_i32 = arith.constant 0 : i32
    %c0_i32_0 = arith.constant 0 : i32
    %c0_i32_1 = arith.constant 0 : i32
    return %arg0, %c0_i32, %c0_i32_0 : i32, i32, i32
  }
}

</mosaic_0001>

<bundles_post_ra>
// kernel: yolov9_forward.1
= control target key start
LH: loop header
LB: loop body
LE: loop exit
PB: predicated region body
PF: predicated region fallthrough
CT: control target
= control target key end

     0   :  { %8 = vsyncpa [#allocation5], 0  ;;  %s3049_s12 = smov 0   ;;  %s3525_s0 = inlined_call_operand.vmem [shape: f32[2,32,96], index: 0, kind: input, shape index: {}]   ;;  %s3526_s1 = inlined_call_operand.hbm [shape: bf16[1744,256], index: 1, kind: input, shape index: {}]   ;;  %s3527_s2 = inlined_call_operand.vmem [shape: f32[112,256], index: 2, kind: input, shape index: {}]   ;;  %s3528_s3 = inlined_call_operand.vmem [shape: f32[2,8,128], index: 3, kind: output, shape index: {}]  }
   0x1 LB: > { %s3055_s13 = sadd.s32 4294967295, %s2998_s12   ;;  %p2376_p0 = scmp.ge.s32.totalorder %s2998_s12, 1  ;;  %s2998_s12 = sphi %s3049_s12, %s14_s12  }
   0x2   : > { %p113_p1 = scmp.lt.s32.totalorder %s2998_s12, 3  ;;  %s3000_s14 = smov [#allocation4]  }
   0x3   : > { %s125_s15 = sshll.u32 %s3000_s14, 4  ;;  %p3529_p3 = scmp.eq.s32.totalorder %s3055_s13, 0  ;;  %s126_s15 = int_to_ptr.vmem [resolvable:$true] %s125_s15 }
   0x4   : > { %p3059_p2 = pnand %p2376_p0, %p113_p1  ;;  %s2960_s20 = scalar_lea.hbm %s3526_s1, 27904 }
   0x5   : > { %p2961_p6 = scmp.ne.s32.totalorder %s3526_s1, %s2960_s20  ;;  %p2967_p10 = scmp.lt.u32.totalorder %s2960_s20, %s3526_s1 }
   0x6   : > { %s3531_s16 = scalar_select %p3059_p2, 1, 0 }
   0x7   : > { %p2718_p4 = pneg %p3059_p2 }
   0x9   : > { %p3068_p5 = pnand %p3529_p3, %p2718_p4 }
   0xb   : > { %p2962_p7 = pneg %p3068_p5 }
   0xd   : > { %p2963_p8 = pnand %p2962_p7, %p2961_p6 }
   0xf   : > { %p2964_p9 = pneg %p2963_p8 }
  0x11   : > { %p2969_p11 = pnand %p2967_p10, %p2964_p9 }
  0x13   : > { %2972 = shalt.err (!%p2969_p11)
}
  0x14   : > { %s2973_s25 = scalar_lea.vmem %s126_s15, 27904  ;;  %p2981_p1 = scmp.lt.s32.totalorder %s126_s15, %s126_s15 }
  0x15   : > { %p2974_p12 = scmp.ne.s32.totalorder %s126_s15, %s2973_s25  ;;  %p2982_p4 = scmp.lt.s32.totalorder %s2973_s25, %s2973_s25 }
  0x17   : > { %p2976_p13 = pnand %p2974_p12, %p2962_p7  ;;  %p2983_p3 = por %p2982_p4, %p2981_p1 }
  0x19   : > { %p2977_p0 = pneg %p2976_p13 }
  0x1b   : > { %p2984_p2 = pnand %p2983_p3, %p2977_p0 }
  0x1d   : > { %2987 = shalt.err (!%p2984_p2)
}
  0x1e   : > { %s3001_s26 = smov 128   ;;  %s3002_s27 = smov 8  }
  0x1f   : > { %2721 = dma.hbm_to_vmem [thread:$0]  (!%p3068_p5), %s3526_s1, 27904, %s126_s15, [#allocation5], %s3001_s26, %s3001_s26, %s3002_s27  }
  0x20   : > { %p3533_p6 = scmp.ne.s32.totalorder %s3531_s16, 0 }
  0x21   : > { %p3534_p8 = scmp.eq.s32.totalorder (!%p3533_p6), %s3055_s13, 0 }
  0x22   : > { %152 = sbr.rel (%p3533_p6) target bundleno = 2748 (0xabc), region = 32 }
  0x29   : > { %2993 = dma.done.wait (%p3534_p8), [#allocation5], 27904   ;;  %p3535_p7 = pmov %p3534_p8 }
  0x2a   : > { %p175_p2 = scmp.lt.s32.totalorder %s3055_s13, 1  ;;  %vm190_vm0 = vcmask 778240   ;;  %v3003_v0 = vmov 0.0   ;;  %vm193_vm1 = vcmask 785408   ;;  %v2761_v5 = vld [vmem:[#allocation4 + $0x80] ss:$8 sps:$4 sm:$0xff]  }
  0x2b   : > { %2995 = vsyncadd (%p3535_p7), [#allocation5], 4294939392  ;;  %2636 = vmatprep.subr.bf16.mxu1 %v3003_v0  ;;  %191 = vst.msk [vmem:[#allocation2] sm:$0x1] %vm190_vm0, %v3003_v0  ;;  %v2762_v6 = vld [vmem:[#allocation4] ss:$8 sps:$4 sm:$0xff]   ;;  %2515 = vmatprep.subr.bf16.mxu0 %v2761_v5 }
  0x2c   : > { %s3539_s13 = smov (!%p175_p2, %s3055_s13), 1  ;;  %v2763_v7 = vld [vmem:[#allocation4 + $0x90] ss:$8 sps:$4 sm:$0xff]   ;;  %2516 = vmatpush3.bf16.msra.mxu0 %v2762_v6  ;;  %v2765_v9 = vld [vmem:[#allocation4 + $0xa0] ss:$8 sps:$4 sm:$0xff]   ;;  %s3004_s7 = smov 96  }
  0x2d   : > { %s2514_s30 = sshll.u32 %s3539_s13, 5  ;;  %v2764_v8 = vld [vmem:[#allocation4 + $0x10] ss:$8 sps:$4 sm:$0xff]   ;;  %2517 = vmatprep.subr.bf16.mxu0 %v2763_v7  ;;  %v2766_v12 = vld [vmem:[#allocation4 + $0x20] ss:$8 sps:$4 sm:$0xff]   ;;  %s3005_s8 = smov 64  }
  0x2e   : > { %s179_s6 = scalar_lea.vmem %s3525_s0, %s2514_s30  ;;  %v2767_v16 = vld [vmem:[#allocation4 + $0xb0] ss:$8 sps:$4 sm:$0xff]   ;;  %v2769_v21 = vld [vmem:[#allocation4 + $0xc0] ss:$8 sps:$4 sm:$0xff]   ;;  %vm3006_vm2 = vmmov 0   ;;  %vm212_vm3 = vcmask 1048320  }
  0x2f   : > { %v186_v1 = vld [vmem:[%s179_s6] sm:$0xff]  ;;  %v187_v2 = vld [vmem:[%s179_s6 + $0x8] sm:$0xff]  ;;  %v188_v3 = vld [vmem:[%s179_s6 + $0x10] sm:$0xff]  ;;  %2640 = vmatprep.mubr.msk.bf16.mxu1 %vm3006_vm2, %v3003_v0  ;;  %vm214_vm4 = vcmask 523264   ;;  %vm225_vm5 = vcmask 1048064   ;;  %vm227_vm6 = vcmask 261120  }
  0x30   : > { %v189_v4 = vld [vmem:[%s179_s6 + $0x18] sm:$0xff]  ;;  %194 = vst.msk [vmem:[#allocation2 + $0x1] sm:$0xff] %vm193_vm1, %v186_v1  ;;  %195 = vst.msk [vmem:[#allocation2 + $0x9] sm:$0xff] %vm193_vm1, %v187_v2  ;;  %2518 = vmatpush3.bf16.msra.mxu0 %v2764_v8  ;;  %v2770_v23 = vld [vmem:[#allocation4 + $0x40] ss:$8 sps:$4 sm:$0xff]   ;;  %vm1069_vm7 = vcmask 781312  }
  0x31   : > { %196 = vst.msk [vmem:[#allocation2 + $0x11] sm:$0xff] %vm193_vm1, %v188_v3  ;;  %197 = vst.msk [vmem:[#allocation2 + $0x19] sm:$0xff] %vm193_vm1, %v189_v4  ;;  %2519 = vmatprep.subr.bf16.mxu0 %v2765_v9  ;;  %v2768_v18 = vld [vmem:[#allocation4 + $0x30] ss:$8 sps:$4 sm:$0xff]   ;;  %v2774_v24 = vld [vmem:[#allocation4 + $0x100] ss:$8 sps:$4 sm:$0xff]  }
  0x32   : > { %v2771_v25 = vld [vmem:[#allocation4 + $0xd0] ss:$8 sps:$4 sm:$0xff]   ;;  %2637 = vmatpush3.bf16.msra.mxu1 %v2774_v24  ;;  %v2773_v28 = vld [vmem:[#allocation4 + $0xe0] ss:$8 sps:$4 sm:$0xff]   ;;  %vm1082_vm8 = vcmask 516096   ;;  %vm1080_vm9 = vcmask 1041152  }
  0x33   : > { %v2772_v26 = vld [vmem:[#allocation4 + $0x50] ss:$8 sps:$4 sm:$0xff]   ;;  %2638 = vmatprep.subr.bf16.mxu1 %v3003_v0  ;;  %v2775_v29 = vld [vmem:[#allocation4 + $0x60] ss:$8 sps:$4 sm:$0xff]   ;;  %vm1090_vm10 = vcmask 1040896   ;;  %vm1092_vm11 = vcmask 253952  }
  0x34   : > { %2520 = vmatpush3.bf16.msra.mxu0 %v2766_v12  ;;  %v2777_v27 = vld [vmem:[#allocation4 + $0x110] ss:$8 sps:$4 sm:$0xff]   ;;  %v2779_v37 = vld [vmem:[#allocation4 + $0x1a0] ss:$8 sps:$4 sm:$0xff]   ;;  %vm1339_vm12 = vsmask.f32 256 }
  0x35   : > { %2521 = vmatprep.subr.bf16.mxu0 %v2767_v16  ;;  %v2776_v30 = vld [vmem:[#allocation4 + $0xf0] ss:$8 sps:$4 sm:$0xff]   ;;  %v2780_v38 = vld [vmem:[#allocation4 + $0x220] ss:$8 sps:$4 sm:$0xff]   ;;  %vm3174_vm13 = vmand %vm1082_vm8, %vm1339_vm12  ;;  %s2383_s17 = sshll.u32 %s3539_s13, 3  ;;  %vm1806_vm14 = vcmask 519168  }
  0x36   : > { %2639 = vmatpush3.bf16.msra.mxu1 %v2777_v27  ;;  %v2778_v31 = vld [vmem:[#allocation4 + $0x70] ss:$8 sps:$4 sm:$0xff]   ;;  %v2781_v39 = vld [vmem:[#allocation4 + $0x120] ss:$8 sps:$4 sm:$0xff]   ;;  %s3193_s20 = scalar_lea.vmem %s3528_s3, %s2383_s17  ;;  %s3008_s24 = smov 112   ;;  %vm1334_vm15 = vcmask 517120  }
  0x37   : > { %v204_v10 = vld [vmem:[#allocation2 + $0x1] ss:$2 sm:$0xff]  ;;  %v217_v11 = vld [vmem:[#allocation2 + $0x2] ss:$2 sm:$0xff]  ;;  %2540 = vmatprep.subr.bf16.mxu1 %v2779_v37  ;;  %v268_v1 = vld [vmem:[%s3527_s2] ss:$0 sm:$0xff]  ;;  %185 = vst [vmem:[%s3193_s20] sm:$0xff] %v3003_v0 }
  0x38   : > { %v206_v13 = vld [vmem:[#allocation2 + $0x11] ss:$2 sm:$0xff]  ;;  %v219_v14 = vld [vmem:[#allocation2 + $0x12] ss:$2 sm:$0xff]  ;;  %2522 = vmatpush3.bf16.msra.mxu0 %v2768_v18  ;;  %s3009_s25 = smov 80   ;;  %s3010_s26 = smov 48  }
  0x39   : > { %v207_v15 = vpack.c.bf16 %v206_v13, %v204_v10  ;;  %477 = vst [vmem:[#allocation2 + $0x11] sm:$0x1] %v3003_v0  ;;  %v220_v17 = vpack.c.bf16 %v219_v14, %v217_v11  ;;  %v200_v19 = vld [vmem:[#allocation2 + $0x10] ss:$2 sm:$0xff]  ;;  %v198_v20 = vld [vmem:[#allocation2] ss:$2 sm:$0xff]  ;;  %2523 = vmatprep.subr.bf16.mxu0 %v2769_v21 }
  0x3a   : > { %v201_v22 = vpack.c.bf16 %v200_v19, %v198_v20  ;;  %476 = vst [vmem:[#allocation2] sm:$0x1] %v3003_v0  ;;  %v2782_v40 = vld [vmem:[#allocation4 + $0x1b0] ss:$8 sps:$4 sm:$0xff]   ;;  %v2785_v43 = vld [vmem:[#allocation4 + $0x1c0] ss:$8 sps:$4 sm:$0xff]  }
  0x3b   : > { %209 = vrot.lane.b32.xlu0 %v207_v15, %s3004_s7  ;;  %v2783_v41 = vld [vmem:[#allocation4 + $0x230] ss:$8 sps:$4 sm:$0xff]   ;;  %v2786_v44 = vld [vmem:[#allocation4 + $0x240] ss:$8 sps:$4 sm:$0xff]   ;;  %s3011_s27 = smov 16   ;;  %s3012_s28 = smov 32  }
  0x3c   : > { %202 = vst.msk [vmem:[#allocation3] sm:$0xff] %vm193_vm1, %v201_v22  ;;  %2524 = vmatpush3.bf16.msra.mxu0 %v2770_v23  ;;  %v2784_v42 = vld [vmem:[#allocation4 + $0x130] ss:$8 sps:$4 sm:$0xff]   ;;  %v2787_v45 = vld [vmem:[#allocation4 + $0x140] ss:$8 sps:$4 sm:$0xff]   ;;  %s3013_s4 = smov 120  }
  0x3d   : > { %2525 = vmatprep.subr.bf16.mxu0 %v2771_v25  ;;  %v2788_v46 = vld [vmem:[#allocation4 + $0x1d0] ss:$8 sps:$4 sm:$0xff]   ;;  %v2791_v49 = vld [vmem:[#allocation4 + $0x1e0] ss:$8 sps:$4 sm:$0xff]   ;;  %s3014_s5 = smov 104   ;;  %s3015_s6 = smov 88  }
  0x3e   : > { %v2789_v47 = vld [vmem:[#allocation4 + $0x250] ss:$8 sps:$4 sm:$0xff]   ;;  %v2792_v50 = vld [vmem:[#allocation4 + $0x260] ss:$8 sps:$4 sm:$0xff]   ;;  %s3016_s15 = smov 124   ;;  %s3017_s16 = smov 116  }
  0x3f   : > { %222 = vrot.lane.b32.xlu0 %v220_v17, %s3005_s8  ;;  %v2790_v48 = vld [vmem:[#allocation4 + $0x150] ss:$8 sps:$4 sm:$0xff]   ;;  %v2793_v51 = vld [vmem:[#allocation4 + $0x160] ss:$8 sps:$4 sm:$0xff]   ;;  %s3018_s17 = smov 108   ;;  %s3019_s18 = smov 72  }
  0x40   : > { %2526 = vmatpush3.bf16.msra.mxu0 %v2772_v26  ;;  %v2794_v52 = vld [vmem:[#allocation4 + $0x1f0] ss:$8 sps:$4 sm:$0xff]   ;;  %v2797_v55 = vld [vmem:[#allocation4 + $0x200] ss:$8 sps:$4 sm:$0xff]   ;;  %s3020_s19 = smov 100   ;;  %s3021_s13 = smov 8  }
  0x41   : > { %2527 = vmatprep.subr.bf16.mxu0 %v2773_v28  ;;  %v2795_v53 = vld [vmem:[#allocation4 + $0x270] ss:$8 sps:$4 sm:$0xff]   ;;  %v2798_v56 = vld [vmem:[#allocation4 + $0x280] ss:$8 sps:$4 sm:$0xff]   ;;  %s3022_s21 = smov 24   ;;  %s3023_s22 = smov 40  }
  0x42   : > { %v2796_v54 = vld [vmem:[#allocation4 + $0x170] ss:$8 sps:$4 sm:$0xff]   ;;  %v2799_v57 = vld [vmem:[#allocation4 + $0x180] ss:$8 sps:$4 sm:$0xff]   ;;  %s3024_s23 = smov 4   ;;  %s3025_s29 = smov 12  }
  0x43   : > { %v2800_v58 = vld [vmem:[#allocation4 + $0x210] ss:$8 sps:$4 sm:$0xff]   ;;  %s3026_s30 = smov 20   ;;  %s3027_s9 = smov 28  }
  0x44   : > { %2528 = vmatpush3.bf16.msra.mxu0 %v2775_v29  ;;  %v2801_v59 = vld [vmem:[#allocation4 + $0x290] ss:$8 sps:$4 sm:$0xff]   ;;  %s3028_s10 = smov 56  }
  0x45   : > { %2529 = vmatprep.subr.bf16.mxu0 %v2776_v30  ;;  %v2802_v60 = vld [vmem:[#allocation4 + $0x190] ss:$8 sps:$4 sm:$0xff]  }
  0x46   : > { %v2808_v37 = vld [vmem:[#allocation4 + $0x2b0] ss:$8 sps:$4 sm:$0xff]  }
  0x48   : > { %2530 = vmatpush3.bf16.msra.mxu0 %v2778_v31 }
  0x49   : > { %2644 = vmatprep.subr.bf16.mxu0 %v3003_v0 }
  0xad   : > { %v210_v32 = vpop.permute.xlu0 %209 }
  0xae   : > { %213 = vst.msk [vmem:[#allocation3] sm:$0xff] %vm212_vm3, %v210_v32  ;;  %vm2301_vm3 = vcmask 122880  }
  0xaf   : > { %215 = vst.msk [vmem:[#allocation3 + $0x8] sm:$0xff] %vm214_vm4, %v210_v32  ;;  %v2803_v32 = vld [vmem:[#allocation4 + $0x320] ss:$8 sps:$4 sm:$0xff]  }
  0xb1   : > { %v223_v33 = vpop.permute.xlu0 %222 }
  0xb2   : > { %226 = vst.msk [vmem:[#allocation3 + $0x8] sm:$0xff] %vm225_vm5, %v223_v33  ;;  %vm2307_vm5 = vcmask 155776  }
  0xb3   : > { %228 = vst.msk [vmem:[#allocation3 + $0x10] sm:$0xff] %vm227_vm6, %v223_v33  ;;  %v2804_v33 = vld [vmem:[#allocation4 + $0x3a0] ss:$8 sps:$4 sm:$0xff]  }
  0xb5   : > { %v229_v36 = vld [vmem:[#allocation3] sm:$0xff] }
  0xb9   : > { %v230_v34 = vld [vmem:[#allocation3 + $0x8] sm:$0xff] }
  0xba   : > { %v231_v35 = vld [vmem:[#allocation3 + $0x10] sm:$0xff]  ;;  %412 = vmatprep.mubr.bf16.mxu0 %v230_v34  ;;  %v2805_v34 = vld [vmem:[#allocation4 + $0x2a0] ss:$8 sps:$4 sm:$0xff]  }
  0xbb   : > { %2641 = vmatmul.mubr.msk.bf16.vlgmr.msra.gmra.mrb[0].mxu1 %vm227_vm6, %v231_v35  ;;  %413 = vmatmul.mubr.bf16.vlgmr.msra.gmra.mrb[0].mxu0 %v229_v36  ;;  %v2806_v35 = vld [vmem:[#allocation4 + $0x330] ss:$8 sps:$4 sm:$0xff]  }
  0xbc   : > { %2660 = vmatprep.mubr.msk.bf16.mxu0 %vm3006_vm2, %v3003_v0  ;;  %2645 = vmatpush3.bf16.msra.mxu0 %v2780_v38  ;;  %v2807_v36 = vld [vmem:[#allocation4 + $0x3b0] ss:$8 sps:$4 sm:$0xff]   ;;  %v2809_v38 = vld [vmem:[#allocation4 + $0x340] ss:$8 sps:$4 sm:$0xff]  }
  0xbd   : > { %2541 = vmatpush3.bf16.msra.mxu1 %v2781_v39  ;;  %2646 = vmatprep.subr.bf16.mxu0 %v3003_v0  ;;  %v2810_v39 = vld [vmem:[#allocation4 + $0x3c0] ss:$8 sps:$4 sm:$0xff]  }
  0xbe   : > { %2542 = vmatprep.subr.bf16.mxu1 %v2782_v40  ;;  %v2811_v40 = vld [vmem:[#allocation4 + $0x2c0] ss:$8 sps:$4 sm:$0xff]  }
  0xc0   : > { %2647 = vmatpush3.bf16.msra.mxu0 %v2783_v41  ;;  %v2812_v41 = vld [vmem:[#allocation4 + $0x350] ss:$8 sps:$4 sm:$0xff]  }
  0xc1   : > { %2543 = vmatpush3.bf16.msra.mxu1 %v2784_v42  ;;  %2648 = vmatprep.subr.bf16.mxu0 %v3003_v0  ;;  %v2813_v42 = vld [vmem:[#allocation4 + $0x3d0] ss:$8 sps:$4 sm:$0xff]  }
  0xc2   : > { %2544 = vmatprep.subr.bf16.mxu1 %v2785_v43  ;;  %v2814_v43 = vld [vmem:[#allocation4 + $0x2d0] ss:$8 sps:$4 sm:$0xff]  }
  0xc4   : > { %2649 = vmatpush3.bf16.msra.mxu0 %v2786_v44  ;;  %v2815_v44 = vld [vmem:[#allocation4 + $0x360] ss:$8 sps:$4 sm:$0xff]  }
  0xc5   : > { %2545 = vmatpush3.bf16.msra.mxu1 %v2787_v45  ;;  %2650 = vmatprep.subr.bf16.mxu0 %v3003_v0  ;;  %v2816_v45 = vld [vmem:[#allocation4 + $0x3e0] ss:$8 sps:$4 sm:$0xff]  }
  0xc6   : > { %2546 = vmatprep.subr.bf16.mxu1 %v2788_v46  ;;  %v2817_v46 = vld [vmem:[#allocation4 + $0x2e0] ss:$8 sps:$4 sm:$0xff]  }
  0xc8   : > { %2651 = vmatpush3.bf16.msra.mxu0 %v2789_v47  ;;  %v2818_v47 = vld [vmem:[#allocation4 + $0x370] ss:$8 sps:$4 sm:$0xff]  }
  0xc9   : > { %2547 = vmatpush3.bf16.msra.mxu1 %v2790_v48  ;;  %2652 = vmatprep.subr.bf16.mxu0 %v3003_v0  ;;  %v2819_v48 = vld [vmem:[#allocation4 + $0x3f0] ss:$8 sps:$4 sm:$0xff]  }
  0xca   : > { %2548 = vmatprep.subr.bf16.mxu1 %v2791_v49  ;;  %v2820_v49 = vld [vmem:[#allocation4 + $0x2f0] ss:$8 sps:$4 sm:$0xff]  }
  0xcc   : > { %2653 = vmatpush3.bf16.msra.mxu0 %v2792_v50  ;;  %v2821_v50 = vld [vmem:[#allocation4 + $0x380] ss:$8 sps:$4 sm:$0xff]  }
  0xcd   : > { %2549 = vmatpush3.bf16.msra.mxu1 %v2793_v51  ;;  %2654 = vmatprep.subr.bf16.mxu0 %v3003_v0  ;;  %v2822_v51 = vld [vmem:[#allocation4 + $0x400] ss:$8 sps:$4 sm:$0xff]  }
  0xce   : > { %2550 = vmatprep.subr.bf16.mxu1 %v2794_v52  ;;  %v2823_v52 = vld [vmem:[#allocation4 + $0x300] ss:$8 sps:$4 sm:$0xff]  }
  0xd0   : > { %2655 = vmatpush3.bf16.msra.mxu0 %v2795_v53  ;;  %v2824_v53 = vld [vmem:[#allocation4 + $0x390] ss:$8 sps:$4 sm:$0xff]  }
  0xd1   : > { %2551 = vmatpush3.bf16.msra.mxu1 %v2796_v54  ;;  %2656 = vmatprep.subr.bf16.mxu0 %v3003_v0  ;;  %v2825_v54 = vld [vmem:[#allocation4 + $0x410] ss:$8 sps:$4 sm:$0xff]  }
  0xd2   : > { %2552 = vmatprep.subr.bf16.mxu1 %v2797_v55  ;;  %v2826_v55 = vld [vmem:[#allocation4 + $0x310] ss:$8 sps:$4 sm:$0xff]  }
  0xd4   : > { %2657 = vmatpush3.bf16.msra.mxu0 %v2798_v56 }
  0xd5   : > { %2553 = vmatpush3.bf16.msra.mxu1 %v2799_v57  ;;  %2658 = vmatprep.subr.bf16.mxu0 %v3003_v0 }
  0xd6   : > { %2554 = vmatprep.subr.bf16.mxu1 %v2800_v58 }
  0xd8   : > { %2659 = vmatpush3.bf16.msra.mxu0 %v2801_v59  ;;  %v540_v59 = vld [vmem:[%s3527_s2 + $0x10] ss:$0 sm:$0xff] }
  0xd9   : > { %2555 = vmatpush3.bf16.msra.mxu1 %v2802_v60  ;;  %2664 = vmatprep.subr.bf16.mxu0 %v3003_v0 }
  0xda   : > { %2571 = vmatprep.subr.bf16.mxu1 %v2803_v32  ;;  %v835_v32 = vld [vmem:[%s3527_s2 + $0x20] ss:$0 sm:$0xff] }
 0x18e   : > { %v455_v61 = vpop.f32.mrb[0].mxu1  ;;  %v2531_v62 = vpop.f32.mrb[0].mxu0 }
 0x18f   : > { %v2642_v63 = vpop.f32.mrb[1].mxu1  ;;  %v2532_v2 = vpop.f32.mrb[1].mxu0 }
 0x190   : > { %v458_v3 = vpop.f32.mrb[2].mxu1  ;;  %v2533_v4 = vadd.f32 %v2532_v2, %v2531_v62  ;;  %v2534_v5 = vpop.f32.mrb[2].mxu0 }
 0x191   : > { %v2643_v6 = vpop.f32.mrb[3].mxu1  ;;  %v2535_v7 = vpop.f32.mrb[3].mxu0 }
 0x192   : > { %v415_v8 = vadd.f32 %v2533_v4, %v268_v1  ;;  %v2536_v9 = vadd.f32 %v2535_v7, %v2534_v5 }
 0x194   : > { %v456_v10 = vadd.f32 %v455_v61, %v415_v8  ;;  %v418_v11 = vadd.f32 %v2536_v9, %v268_v1 }
 0x196   : > { %v2403_v12 = vmul.f32 -1.442695, %v456_v10  ;;  %v459_v13 = vadd.f32 %v458_v3, %v418_v11 }
 0x198   : > { %2882 = vpow2.f32 %v2403_v12  ;;  %v2404_v14 = vmul.f32 -1.442695, %v459_v13 }
 0x19a   : > { %2884 = vpow2.f32 %v2404_v14 }
 0x1a2   : > { %v2883_v15 = vpop.eup %2882 }
 0x1a3   : > { %v468_v16 = vadd.f32 1.0, %v2883_v15 }
 0x1a4   : > { %v2885_v17 = vpop.eup %2884 }
 0x1a5   : > { %2886 = vrcp.f32 %v468_v16  ;;  %v469_v18 = vadd.f32 1.0, %v2885_v17 }
 0x1a7   : > { %2888 = vrcp.f32 %v469_v18 }
 0x1af   : > { %v2887_v19 = vpop.eup %2886 }
 0x1b0   : > { %v474_v20 = vmul.f32 %v2887_v19, %v456_v10  ;;  %v2827_v19 = vld [vmem:[#allocation4 + $0x4a0] ss:$8 sps:$4 sm:$0xff]  }
 0x1b1   : > { %v2889_v21 = vpop.eup %2888 }
 0x1b2   : > { %478 = vst [vmem:[#allocation2 + $0x1] sm:$0xff] %v474_v20  ;;  %v475_v22 = vmul.f32 %v2889_v21, %v459_v13  ;;  %v2828_v20 = vld [vmem:[#allocation4 + $0x420] ss:$8 sps:$4 sm:$0xff]   ;;  %v2829_v21 = vld [vmem:[#allocation4 + $0x4b0] ss:$8 sps:$4 sm:$0xff]  }
 0x1b4   : > { %479 = vst [vmem:[#allocation2 + $0x9] sm:$0xff] %v475_v22  ;;  %v2830_v22 = vld [vmem:[#allocation4 + $0x430] ss:$8 sps:$4 sm:$0xff]  }
 0x1bb   : > { %v483_v23 = vld [vmem:[#allocation2 + $0x1] ss:$2 sm:$0xff]  ;;  %v486_v24 = vld [vmem:[#allocation2 + $0x2] ss:$2 sm:$0xff] }
 0x1bc   : > { %v480_v25 = vld [vmem:[#allocation2] ss:$2 sm:$0xff]  ;;  %773 = vst [vmem:[#allocation2 + $0x9] sm:$0x1] %v3003_v0  ;;  %v484_v26 = vpack.c.bf16 %v483_v23, %v483_v23  ;;  %v487_v27 = vpack.c.bf16 %v486_v24, %v486_v24 }
 0x1bd   : > { %v481_v28 = vpack.c.bf16 %v480_v25, %v480_v25  ;;  %772 = vst [vmem:[#allocation2] sm:$0x1] %v3003_v0  ;;  %v2831_v23 = vld [vmem:[#allocation4 + $0x4c0] ss:$8 sps:$4 sm:$0xff]   ;;  %v2833_v25 = vld [vmem:[#allocation4 + $0x4d0] ss:$8 sps:$4 sm:$0xff]  }
 0x1be   : > { %485 = vst [vmem:[#allocation3 + $0x8] sm:$0xf] %v484_v26  ;;  %488 = vst [vmem:[#allocation3 + $0x10] sm:$0xf] %v487_v27  ;;  %v2832_v24 = vld [vmem:[#allocation4 + $0x440] ss:$8 sps:$4 sm:$0xff]  }
 0x1bf   : > { %482 = vst [vmem:[#allocation3] sm:$0xf] %v481_v28  ;;  %v2834_v26 = vld [vmem:[#allocation4 + $0x450] ss:$8 sps:$4 sm:$0xff]   ;;  %v2835_v27 = vld [vmem:[#allocation4 + $0x4e0] ss:$8 sps:$4 sm:$0xff]  }
 0x1c0   : > { %v2836_v28 = vld [vmem:[#allocation4 + $0x460] ss:$8 sps:$4 sm:$0xff]  }
 0x1c5   : > { %v490_v29 = vld [vmem:[#allocation3 + $0x8] sm:$0xf]  ;;  %v491_v30 = vld [vmem:[#allocation3 + $0x10] sm:$0xf] }
 0x1c6   : > { %v489_v31 = vld [vmem:[#allocation3] sm:$0xf]  ;;  %717 = vmatprep.mubr.bf16.mxu1 %v490_v29  ;;  %2661 = vmatmul.mubr.bf16.vlgmr.msra.gmra.mrb[4].mxu0 %v491_v30 }
 0x1c7   : > { %718 = vmatmul.mubr.bf16.vlgmr.msra.gmra.mrb[4].mxu1 %v489_v31  ;;  %2680 = vmatprep.mubr.msk.bf16.mxu0 %vm3006_vm2, %v3003_v0 }
 0x1c8   : > { %2665 = vmatpush3.bf16.msra.mxu0 %v2804_v33  ;;  %2572 = vmatpush3.bf16.msra.mxu1 %v2805_v34 }
 0x1c9   : > { %2666 = vmatprep.subr.bf16.mxu0 %v3003_v0  ;;  %2573 = vmatprep.subr.bf16.mxu1 %v2806_v35 }
 0x1cc   : > { %2667 = vmatpush3.bf16.msra.mxu0 %v2807_v36  ;;  %2574 = vmatpush3.bf16.msra.mxu1 %v2808_v37 }
 0x1cd   : > { %2668 = vmatprep.subr.bf16.mxu0 %v3003_v0  ;;  %2575 = vmatprep.subr.bf16.mxu1 %v2809_v38 }
 0x1d0   : > { %2669 = vmatpush3.bf16.msra.mxu0 %v2810_v39  ;;  %2576 = vmatpush3.bf16.msra.mxu1 %v2811_v40 }
 0x1d1   : > { %2670 = vmatprep.subr.bf16.mxu0 %v3003_v0  ;;  %2577 = vmatprep.subr.bf16.mxu1 %v2812_v41 }
 0x1d4   : > { %2671 = vmatpush3.bf16.msra.mxu0 %v2813_v42  ;;  %2578 = vmatpush3.bf16.msra.mxu1 %v2814_v43 }
 0x1d5   : > { %2672 = vmatprep.subr.bf16.mxu0 %v3003_v0  ;;  %2579 = vmatprep.subr.bf16.mxu1 %v2815_v44  ;;  %v2837_v44 = vld [vmem:[#allocation4 + $0x4f0] ss:$8 sps:$4 sm:$0xff]  }
 0x1d8   : > { %2673 = vmatpush3.bf16.msra.mxu0 %v2816_v45  ;;  %2580 = vmatpush3.bf16.msra.mxu1 %v2817_v46  ;;  %v2838_v46 = vld [vmem:[#allocation4 + $0x470] ss:$8 sps:$4 sm:$0xff]  }
 0x1d9   : > { %2674 = vmatprep.subr.bf16.mxu0 %v3003_v0  ;;  %2581 = vmatprep.subr.bf16.mxu1 %v2818_v47 }
 0x1dc   : > { %2675 = vmatpush3.bf16.msra.mxu0 %v2819_v48  ;;  %2582 = vmatpush3.bf16.msra.mxu1 %v2820_v49  ;;  %v2839_v48 = vld [vmem:[#allocation4 + $0x500] ss:$8 sps:$4 sm:$0xff]  }
 0x1dd   : > { %2676 = vmatprep.subr.bf16.mxu0 %v3003_v0  ;;  %2583 = vmatprep.subr.bf16.mxu1 %v2821_v50  ;;  %v2840_v49 = vld [vmem:[#allocation4 + $0x480] ss:$8 sps:$4 sm:$0xff]  }
 0x1de   : > { %v2841_v50 = vld [vmem:[#allocation4 + $0x520] ss:$8 sps:$4 sm:$0xff]  }
 0x1e0   : > { %2677 = vmatpush3.bf16.msra.mxu0 %v2822_v51  ;;  %2584 = vmatpush3.bf16.msra.mxu1 %v2823_v52  ;;  %v2842_v51 = vld [vmem:[#allocation4 + $0x510] ss:$8 sps:$4 sm:$0xff]  }
 0x1e1   : > { %2678 = vmatprep.subr.bf16.mxu0 %v3003_v0  ;;  %2585 = vmatprep.subr.bf16.mxu1 %v2824_v53  ;;  %v2843_v52 = vld [vmem:[#allocation4 + $0x490] ss:$8 sps:$4 sm:$0xff]  }
 0x1e2   : > { %v2844_v53 = vld [vmem:[#allocation4 + $0x530] ss:$8 sps:$4 sm:$0xff]  }
 0x1e4   : > { %2679 = vmatpush3.bf16.msra.mxu0 %v2825_v54  ;;  %2586 = vmatpush3.bf16.msra.mxu1 %v2826_v55 }
 0x1e5   : > { %2684 = vmatprep.subr.bf16.mxu0 %v3003_v0  ;;  %2602 = vmatprep.subr.bf16.mxu1 %v2827_v19  ;;  %v2860_v19 = vld [vmem:[#allocation4 + $0x650] ss:$8 sps:$4 sm:$0xff]  }
 0x299   : > { %v759_v56 = vpop.f32.mrb[4].mxu0 }
 0x29a   : > { %v2556_v57 = vpop.f32.mrb[4].mxu1  ;;  %v2662_v58 = vpop.f32.mrb[5].mxu0 }
 0x29b   : > { %v2557_v60 = vpop.f32.mrb[5].mxu1  ;;  %v762_v61 = vpop.f32.mrb[6].mxu0 }
 0x29c   : > { %v2558_v62 = vadd.f32 %v2557_v60, %v2556_v57  ;;  %v2559_v63 = vpop.f32.mrb[6].mxu1  ;;  %v2663_v1 = vpop.f32.mrb[7].mxu0  ;;  %v2847_v57 = vld [vmem:[#allocation4 + $0x604] ss:$8 sps:$4 sm:$0xff]   ;;  %v3007_v61 = vmov 0  }
 0x29d   : > { %v2560_v2 = vpop.f32.mrb[7].mxu1 }
 0x29e   : > { %v720_v3 = vadd.f32 %v2558_v62, %v540_v59 }
 0x2a0   : > { %v760_v4 = vadd.f32 %v759_v56, %v720_v3 }
 0x2a2   : > { %v2429_v5 = vmul.f32 -1.442695, %v760_v4 }
 0x2a4   : > { %2890 = vpow2.f32 %v2429_v5 }
 0x2ae   : > { %v2891_v6 = vpop.eup %2890 }
 0x2af   : > { %v768_v7 = vadd.f32 1.0, %v2891_v6 }
 0x2b1   : > { %2892 = vrcp.f32 %v768_v7  ;;  %v2845_v7 = vld [vmem:[#allocation4 + $0x600] ss:$8 sps:$4 sm:$0xff]  }
 0x2bb   : > { %v2893_v8 = vpop.eup %2892 }
 0x2bc   : > { %v771_v9 = vmul.f32 %v2893_v8, %v760_v4 }
 0x2be   : > { %774 = vst [vmem:[#allocation2 + $0x1] sm:$0xff] %v771_v9 }
 0x2c5   : > { %v778_v10 = vld [vmem:[#allocation2 + $0x1] ss:$2 sm:$0xf]  ;;  %v781_v11 = vld [vmem:[#allocation2 + $0x2] ss:$2 sm:$0xf] }
 0x2c6   : > { %v779_v12 = vpack.c.bf16 %v778_v10, %v778_v10  ;;  %1068 = vst.msk [vmem:[#allocation2 + $0x5] sm:$0x1] %vm190_vm0, %v3003_v0  ;;  %v782_v13 = vpack.c.bf16 %v781_v11, %v781_v11  ;;  %v775_v14 = vld [vmem:[#allocation2] ss:$2 sm:$0xf] }
 0x2c7   : > { %v776_v15 = vpack.c.bf16 %v775_v14, %v775_v14  ;;  %1067 = vst.msk [vmem:[#allocation2] sm:$0x1] %vm190_vm0, %v3003_v0  ;;  %v2850_v10 = vld [vmem:[#allocation4 + $0x614] ss:$8 sps:$4 sm:$0xff]   ;;  %v2848_v11 = vld [vmem:[#allocation4 + $0x610] ss:$8 sps:$4 sm:$0xff]  }
 0x2c8   : > { %780 = vst [vmem:[#allocation3 + $0x8] sm:$0x3] %v779_v12  ;;  %783 = vst [vmem:[#allocation3 + $0x10] sm:$0x3] %v782_v13  ;;  %v2853_v12 = vld [vmem:[#allocation4 + $0x624] ss:$8 sps:$4 sm:$0xff]  }
 0x2c9   : > { %777 = vst [vmem:[#allocation3] sm:$0x3] %v776_v15  ;;  %v2851_v13 = vld [vmem:[#allocation4 + $0x620] ss:$8 sps:$4 sm:$0xff]   ;;  %v2856_v14 = vld [vmem:[#allocation4 + $0x634] ss:$8 sps:$4 sm:$0xff]  }
 0x2ca   : > { %v2854_v15 = vld [vmem:[#allocation4 + $0x630] ss:$8 sps:$4 sm:$0xff]  }
 0x2cf   : > { %v785_v16 = vld [vmem:[#allocation3 + $0x8] sm:$0x3]  ;;  %v786_v17 = vld [vmem:[#allocation3 + $0x10] sm:$0x3] }
 0x2d0   : > { %1012 = vmatprep.mubr.bf16.mxu1 %v785_v16  ;;  %2681 = vmatmul.mubr.bf16.vlgmr.msra.gmra.mrb[8].mxu0 %v786_v17  ;;  %v784_v18 = vld [vmem:[#allocation3] sm:$0x3]  ;;  %v2859_v16 = vld [vmem:[#allocation4 + $0x644] ss:$8 sps:$4 sm:$0xff]  }
 0x2d1   : > { %1013 = vmatmul.mubr.bf16.vlgmr.msra.gmra.mrb[8].mxu1 %v784_v18  ;;  %2688 = vmatprep.mubr.msk.bf16.mxu0 %vm3006_vm2, %v3003_v0  ;;  %v2857_v17 = vld [vmem:[#allocation4 + $0x640] ss:$8 sps:$4 sm:$0xff]   ;;  %v2862_v18 = vld [vmem:[#allocation4 + $0x654] ss:$8 sps:$4 sm:$0xff]  }
 0x2d2   : > { %2603 = vmatpush3.bf16.msra.mxu1 %v2828_v20  ;;  %2685 = vmatpush3.bf16.msra.mxu0 %v2841_v50 }
 0x2d3   : > { %2604 = vmatprep.subr.bf16.mxu1 %v2829_v21  ;;  %2686 = vmatprep.subr.bf16.mxu0 %v3003_v0  ;;  %v2863_v21 = vld [vmem:[#allocation4 + $0x660] ss:$8 sps:$4 sm:$0xff]  }
 0x2d6   : > { %2605 = vmatpush3.bf16.msra.mxu1 %v2830_v22  ;;  %2687 = vmatpush3.bf16.msra.mxu0 %v2844_v53  ;;  %v2864_v22 = vld [vmem:[#allocation4 + $0x670] ss:$8 sps:$4 sm:$0xff]  }
 0x2d7   : > { %2606 = vmatprep.subr.bf16.mxu1 %v2831_v23  ;;  %1462 = vmatprep.subr.bf16.mxu0 %v3007_v61  ;;  %v2865_v23 = vld [vmem:[#allocation4 + $0x680] ss:$8 sps:$4 sm:$0xff]  }
 0x2da   : > { %2607 = vmatpush3.bf16.msra.mxu1 %v2832_v24  ;;  %v2866_v24 = vld [vmem:[#allocation4 + $0x690] ss:$8 sps:$4 sm:$0xff]  }
 0x2db   : > { %2608 = vmatprep.subr.bf16.mxu1 %v2833_v25  ;;  %v2867_v25 = vld [vmem:[#allocation4 + $0x540] ss:$8 sps:$4 sm:$0xff]  }
 0x2de   : > { %2609 = vmatpush3.bf16.msra.mxu1 %v2834_v26  ;;  %v2868_v26 = vld [vmem:[#allocation4 + $0x550] ss:$8 sps:$4 sm:$0xff]  }
 0x2df   : > { %2610 = vmatprep.subr.bf16.mxu1 %v2835_v27  ;;  %v2869_v27 = vld [vmem:[#allocation4 + $0x560] ss:$8 sps:$4 sm:$0xff]  }
 0x2e2   : > { %2611 = vmatpush3.bf16.msra.mxu1 %v2836_v28  ;;  %v2870_v28 = vld [vmem:[#allocation4 + $0x570] ss:$8 sps:$4 sm:$0xff]  }
 0x2e3   : > { %2612 = vmatprep.subr.bf16.mxu1 %v2837_v44 }
 0x2e6   : > { %2613 = vmatpush3.bf16.msra.mxu1 %v2838_v46 }
 0x2e7   : > { %2614 = vmatprep.subr.bf16.mxu1 %v2839_v48  ;;  %v2489_v48 = vld [vmem:[%s3527_s2 + $0x50] ss:$8 sm:$0x3] }
 0x2ea   : > { %2615 = vmatpush3.bf16.msra.mxu1 %v2840_v49 }
 0x2eb   : > { %2616 = vmatprep.subr.bf16.mxu1 %v2842_v51 }
 0x2ee   : > { %2617 = vmatpush3.bf16.msra.mxu1 %v2843_v52  ;;  %v2874_v52 = vld [vmem:[#allocation4 + $0x5b0] ss:$8 sps:$4 sm:$0xff]  }
 0x2ef   : > { %1598 = vmatprep.subr.bf16.mxu1 %v2847_v57  ;;  %v2875_v57 = vld [vmem:[#allocation4 + $0x5c0] ss:$8 sps:$4 sm:$0xff]  }
 0x3a3   : > { %v1054_v29 = vpop.f32.mrb[8].mxu0 }
 0x3a4   : > { %v2587_v30 = vpop.f32.mrb[8].mxu1  ;;  %v2682_v31 = vpop.f32.mrb[9].mxu0 }
 0x3a5   : > { %v2588_v33 = vpop.f32.mrb[9].mxu1  ;;  %v1057_v34 = vpop.f32.mrb[10].mxu0 }
 0x3a6   : > { %v2589_v35 = vadd.f32 %v2588_v33, %v2587_v30  ;;  %v2590_v36 = vpop.f32.mrb[10].mxu1  ;;  %v2683_v37 = vpop.f32.mrb[11].mxu0  ;;  %v1133_v33 = vld [vmem:[%s3527_s2 + $0x30] ss:$0 sm:$0xff] }
 0x3a7   : > { %v2591_v38 = vpop.f32.mrb[11].mxu1 }
 0x3a8   : > { %v1015_v39 = vadd.f32 %v2589_v35, %v835_v32 }
 0x3aa   : > { %v1055_v40 = vadd.f32 %v1054_v29, %v1015_v39  ;;  %v2871_v29 = vld [vmem:[#allocation4 + $0x580] ss:$8 sps:$4 sm:$0xff]  }
 0x3ac   : > { %v2454_v41 = vmul.f32 -1.442695, %v1055_v40 }
 0x3ae   : > { %2894 = vpow2.f32 %v2454_v41 }
 0x3b8   : > { %v2895_v42 = vpop.eup %2894 }
 0x3b9   : > { %v1063_v43 = vadd.f32 1.0, %v2895_v42 }
 0x3bb   : > { %2896 = vrcp.f32 %v1063_v43  ;;  %v1525_v43 = vlaneseq }
 0x3bd   : > { %v1526_v44 = vshrl.u32 %v1525_v43, 7 }
 0x3bf   : > { %v1527_v46 = vsub.s32 0, %v1526_v44 }
 0x3c1   : > { %v1528_v51 = vrot.slane %v2489_v48, %v1527_v46 }
 0x3c5   : > { %v2897_v45 = vpop.eup %2896 }
 0x3c6   : > { %v3158_v47 = vmul.f32 %v2897_v45, %v1055_v40  ;;  %v2872_v45 = vld [vmem:[#allocation4 + $0x590] ss:$8 sps:$4 sm:$0xff]  }
 0x3c8   : > { %1070 = vst.msk [vmem:[#allocation2 + $0x1] sm:$0xf] %vm1069_vm7, %v3158_v47  ;;  %v1509_v20 = vpack.c.bf16 %v3158_v47, %v3158_v47  ;;  %v2873_v47 = vld [vmem:[#allocation4 + $0x5a0] ss:$8 sps:$4 sm:$0xff]  }
 0x3cf   : > { %v1074_v54 = vld [vmem:[#allocation2 + $0x1] ss:$2 sm:$0x3]  ;;  %v1071_v56 = vld [vmem:[#allocation2] ss:$2 sm:$0x3] }
 0x3d0   : > { %v1075_v55 = vpack.c.bf16 %v1074_v54, %v1074_v54  ;;  %1333 = vst.msk [vmem:[#allocation2 + $0x3] sm:$0x1] %vm1082_vm8, %v3003_v0  ;;  %v1084_v58 = vld [vmem:[#allocation2 + $0x2] ss:$2 sm:$0x3]  ;;  %v1072_v59 = vpack.c.bf16 %v1071_v56, %v1071_v56 }
 0x3d1   : > { %1332 = vst.msk [vmem:[#allocation2] sm:$0x1] %vm1082_vm8, %v3003_v0  ;;  %v1085_v60 = vpack.c.bf16 %v1084_v58, %v1084_v58 }
 0x3d2   : > { %1077 = vrot.lane.b32.xlu1 %v1075_v55, %s3004_s7  ;;  %1073 = vst.msk [vmem:[#allocation3] sm:$0x1] %vm190_vm0, %v1072_v59  ;;  %v1531_v55 = vsub.s32 1, %v1526_v44  ;;  %vm1351_vm0 = vmand %vm1090_vm10, %vm1339_vm12 }
 0x3d6   : > { %1087 = vrot.lane.b32.xlu1 %v1085_v60, %s3005_s8  ;;  %v2876_v60 = vld [vmem:[#allocation4 + $0x5d0] ss:$8 sps:$4 sm:$0xff]  }
 0x3d8   : > { %v1336_v63 = vld [vmem:[#allocation2] ss:$2 sm:$0x1] }
 0x3d9   : > { %v1337_v2 = vpack.c.bf16 %v1336_v63, %v1336_v63 }
 0x444   : > { %v1078_v62 = vpop.permute.xlu1 %1077 }
 0x445   : > { %1081 = vst.msk [vmem:[#allocation3] sm:$0x1] %vm1080_vm9, %v1078_v62 }
 0x446   : > { %1083 = vst.msk [vmem:[#allocation3 + $0x8] sm:$0x1] %vm1082_vm8, %v1078_v62  ;;  %v1532_v62 = vrot.slane %v2489_v48, %v1531_v55 }
 0x448   : > { %v1088_v1 = vpop.permute.xlu1 %1087 }
 0x449   : > { %1091 = vst.msk [vmem:[#allocation3 + $0x8] sm:$0x1] %vm1090_vm10, %v1088_v1 }
 0x44a   : > { %1093 = vst.msk [vmem:[#allocation3 + $0x10] sm:$0x1] %vm1092_vm11, %v1088_v1 }
 0x44c   : > { %v1094_v4 = vld [vmem:[#allocation3] sm:$0x1] }
 0x44d   : > { %v1341_v5 = vld [vmem:[#allocation3] sm:$0x1] }
 0x44e   : > { %v1342_v6 = vsel %vm3174_vm13, %v1337_v2, %v1341_v5 }
 0x44f   : > { %1343 = vst [vmem:[#allocation3] sm:$0x1] %v1342_v6  ;;  %v2878_v6 = vld [vmem:[#allocation4 + $0x5f0] ss:$8 sps:$4 sm:$0xff]  }
 0x450   : > { %v1095_v8 = vld [vmem:[#allocation3 + $0x8] sm:$0x1] }
 0x451   : > { %v1096_v9 = vld [vmem:[#allocation3 + $0x10] sm:$0x1]  ;;  %1277 = vmatprep.mubr.bf16.mxu1 %v1095_v8 }
 0x452   : > { %2689 = vmatmul.mubr.msk.bf16.vlgmr.msra.gmra.mrb[12].mxu0 %vm227_vm6, %v1096_v9  ;;  %1278 = vmatmul.mubr.bf16.vlgmr.msra.gmra.mrb[12].mxu1 %v1094_v4  ;;  %v2877_v4 = vld [vmem:[#allocation4 + $0x5e0] ss:$8 sps:$4 sm:$0xff]   ;;  %vm2063_vm6 = vcmask 320768  }
 0x453   : > { %1599 = vmatpush1.bf16.msra.mxu1 %v2845_v7  ;;  %1630 = vmatprep.mubr.bf16.mxu1 %v3007_v61 }
 0x454   : > { %1600 = vmatprep.subr.bf16.mxu1 %v2850_v10  ;;  %1463 = vmatpush1.bf16.msra.mxu0 %v2867_v25  ;;  %v1386_v25 = vld [vmem:[%s3527_s2 + $0x40] ss:$0 sm:$0xff] }
 0x455   : > { %1464 = vmatprep.subr.bf16.mxu0 %v3007_v61 }
 0x457   : > { %1601 = vmatpush1.bf16.msra.mxu1 %v2848_v11  ;;  %v1357_v11 = vld [vmem:[#allocation3 + $0x8] sm:$0x1] }
 0x458   : > { %1602 = vmatprep.subr.bf16.mxu1 %v2853_v12  ;;  %1465 = vmatpush1.bf16.msra.mxu0 %v2868_v26 }
 0x459   : > { %1466 = vmatprep.subr.bf16.mxu0 %v3007_v61 }
 0x45b   : > { %1603 = vmatpush1.bf16.msra.mxu1 %v2851_v13  ;;  %v1352_v13 = vld [vmem:[#allocation3] sm:$0x1] }
 0x45c   : > { %1604 = vmatprep.subr.bf16.mxu1 %v2856_v14  ;;  %1467 = vmatpush1.bf16.msra.mxu0 %v2869_v27 }
 0x45d   : > { %1468 = vmatprep.subr.bf16.mxu0 %v3007_v61 }
 0x45f   : > { %1605 = vmatpush1.bf16.msra.mxu1 %v2854_v15 }
 0x460   : > { %1606 = vmatprep.subr.bf16.mxu1 %v2859_v16  ;;  %1469 = vmatpush1.bf16.msra.mxu0 %v2870_v28  ;;  %v1823_v16 = vld [vmem:[%s3527_s2 + $0x60] ss:$0 sm:$0xff] }
 0x461   : > { %1470 = vmatprep.subr.bf16.mxu0 %v3007_v61 }
 0x463   : > { %1607 = vmatpush1.bf16.msra.mxu1 %v2857_v17 }
 0x464   : > { %1608 = vmatprep.subr.bf16.mxu1 %v2862_v18  ;;  %1471 = vmatpush1.bf16.msra.mxu0 %v2871_v29 }
 0x465   : > { %1472 = vmatprep.subr.bf16.mxu0 %v3007_v61 }
 0x467   : > { %1609 = vmatpush1.bf16.msra.mxu1 %v2860_v19 }
 0x468   : > { %2692 = vmatprep.subr.bf16.mxu1 %v3003_v0  ;;  %1473 = vmatpush1.bf16.msra.mxu0 %v2872_v45 }
 0x469   : > { %1474 = vmatprep.subr.bf16.mxu0 %v3007_v61 }
 0x46a   : > { %2502 = vmatmul.mubr.msk.bf16.vlgmr.msra.gmra.mrb[16].mxu1 %vm193_vm1, %v1509_v20  ;;  %vm2057_vm1 = vcmask 254976  }
 0x46b   : > { %2700 = vmatprep.mubr.msk.bf16.mxu1 %vm3006_vm2, %v3003_v0  ;;  %2693 = vmatpush3.bf16.msra.mxu1 %v2863_v21 }
 0x46c   : > { %2694 = vmatprep.subr.bf16.mxu1 %v3003_v0  ;;  %1475 = vmatpush1.bf16.msra.mxu0 %v2873_v47 }
 0x46d   : > { %1476 = vmatprep.subr.bf16.mxu0 %v3007_v61 }
 0x46f   : > { %2695 = vmatpush3.bf16.msra.mxu1 %v2864_v22  ;;  %v2879_v22 = vld [vmem:[#allocation4 + $0x6a0] ss:$8 sps:$4 sm:$0xff]  }
 0x470   : > { %2696 = vmatprep.subr.bf16.mxu1 %v3003_v0  ;;  %1477 = vmatpush1.bf16.msra.mxu0 %v2874_v52 }
 0x471   : > { %1478 = vmatprep.subr.bf16.mxu0 %v3007_v61 }
 0x473   : > { %2697 = vmatpush3.bf16.msra.mxu1 %v2865_v23  ;;  %v2880_v23 = vld [vmem:[#allocation4 + $0x6b0] ss:$8 sps:$4 sm:$0xff]  }
 0x474   : > { %2698 = vmatprep.subr.bf16.mxu1 %v3003_v0  ;;  %1479 = vmatpush1.bf16.msra.mxu0 %v2875_v57 }
 0x475   : > { %1480 = vmatprep.subr.bf16.mxu0 %v3007_v61 }
 0x477   : > { %2699 = vmatpush3.bf16.msra.mxu1 %v2866_v24  ;;  %v2881_v24 = vld [vmem:[#allocation4 + $0x6c0] ss:$8 sps:$4 sm:$0xff]  }
 0x478   : > { %2704 = vmatprep.subr.bf16.mxu1 %v3003_v0  ;;  %1481 = vmatpush1.bf16.msra.mxu0 %v2876_v60 }
 0x479   : > { %1482 = vmatprep.subr.bf16.mxu0 %v3007_v61 }
 0x47c   : > { %1483 = vmatpush1.bf16.msra.mxu0 %v2877_v4 }
 0x47d   : > { %1484 = vmatprep.subr.bf16.mxu0 %v3007_v61 }
 0x480   : > { %1485 = vmatpush1.bf16.msra.mxu0 %v2878_v6 }
 0x525   : > { %v1319_v30 = vpop.f32.mrb[12].mxu0  ;;  %v2618_v31 = vpop.f32.mrb[12].mxu1 }
 0x526   : > { %v2690_v32 = vpop.f32.mrb[13].mxu0  ;;  %v2619_v34 = vpop.f32.mrb[13].mxu1 }
 0x527   : > { %v1322_v35 = vpop.f32.mrb[14].mxu0  ;;  %v2620_v36 = vadd.f32 %v2619_v34, %v2618_v31  ;;  %v2621_v37 = vpop.f32.mrb[14].mxu1 }
 0x528   : > { %v2691_v38 = vpop.f32.mrb[15].mxu0  ;;  %v2622_v39 = vpop.f32.mrb[15].mxu1 }
 0x529   : > { %v1280_v40 = vadd.f32 %v2620_v36, %v1133_v33 }
 0x52b   : > { %v1320_v41 = vadd.f32 %v1319_v30, %v1280_v40  ;;  %v2072_v40 = vld [vmem:[%s3527_s2 + $0x70] ss:$0 sm:$0xff] }
 0x52d   : > { %v2474_v42 = vmul.f32 -1.442695, %v1320_v41 }
 0x52f   : > { %2898 = vpow2.f32 %v2474_v42 }
 0x539   : > { %v2899_v49 = vpop.eup %2898 }
 0x53a   : > { %v1328_v50 = vadd.f32 1.0, %v2899_v49 }
 0x53c   : > { %2900 = vrcp.f32 %v1328_v50 }
 0x53d   : > { %v1632_v53 = vpop.f32.mrb[16].mxu1 }
 0x53e   : > { %v3213_v54 = vadd.f32 %v1632_v53, %v1528_v51  ;;  %v1634_v56 = vpop.f32.mrb[17].mxu1 }
 0x53f   : > { %v1636_v58 = vpop.f32.mrb[18].mxu1  ;;  %v3223_v1 = vadd.f32 %v1634_v56, %v1532_v62 }
 0x540   : > { %v1637_v59 = vpop.f32.mrb[19].mxu1  ;;  %1640 = vrot.lane.b32.xlu1 %v3213_v54, %s3008_s24  ;;  %1807 = vst.msk [vmem:[%s3193_s20] sm:$0xf] %vm1806_vm14, %v3213_v54 }
 0x544   : > { %1648 = vrot.lane.b32.xlu1 %v3213_v54, %s3009_s25 }
 0x546   : > { %v2901_v63 = vpop.eup %2900 }
 0x547   : > { %v1331_v2 = vmul.f32 %v2901_v63, %v1320_v41 }
 0x548   : > { %1657 = vrot.lane.b32.xlu1 %v3223_v1, %s3010_s26 }
 0x549   : > { %v1814_v5 = vpack.c.bf16 %v1331_v2, %v1331_v2  ;;  %1335 = vst.msk [vmem:[#allocation2 + $0x1] sm:$0x3] %vm1334_vm15, %v1331_v2 }
 0x54b   : > { %2701 = vmatmul.mubr.msk.bf16.vlgmr.msra.gmra.mrb[20].mxu1 %vm214_vm4, %v1814_v5 }
 0x54c   : > { %1665 = vrot.lane.b32.xlu1 %v3223_v1, %s3011_s27  ;;  %2710 = vmatprep.mubr.msk.bf16.mxu1 %vm3006_vm2, %v3003_v0  ;;  %vm2091_vm2 = vcmask 392192  }
 0x54d   : > { %2705 = vmatpush3.bf16.msra.mxu1 %v2879_v22 }
 0x54e   : > { %2706 = vmatprep.subr.bf16.mxu1 %v3003_v0 }
 0x550   : > { %v1344_v7 = vld [vmem:[#allocation2 + $0x1] ss:$2 sm:$0x1]  ;;  %v1355_v8 = vld [vmem:[#allocation2 + $0x2] ss:$2 sm:$0x1] }
 0x551   : > { %v1345_v9 = vpack.c.bf16 %v1344_v7, %v1344_v7  ;;  %v1356_v10 = vpack.c.bf16 %v1355_v8, %v1355_v8  ;;  %2707 = vmatpush3.bf16.msra.mxu1 %v2880_v23 }
 0x552   : > { %2708 = vmatprep.subr.bf16.mxu1 %v3003_v0 }
 0x553   : > { %1347 = vrot.lane.b32.xlu0 %v1345_v9, %s3005_s8  ;;  %v1358_v61 = vsel %vm3174_vm13, %v1356_v10, %v1357_v11 }
 0x554   : > { %1359 = vst [vmem:[#allocation3 + $0x8] sm:$0x1] %v1358_v61 }
 0x555   : > { %2709 = vmatpush3.bf16.msra.mxu1 %v2881_v24 }
 0x557   : > { %1644 = vrot.lane.b32.xlu0 %v3213_v54, %s3004_s7 }
 0x55b   : > { %1653 = vrot.lane.b32.xlu0 %v3223_v1, %s3005_s8  ;;  %v1361_v12 = vld [vmem:[#allocation3 + $0x8] sm:$0x1] }
 0x55c   : > { %2487 = vmatprep.mubr.msk.bf16.mxu0 %vm214_vm4, %v1361_v12  ;;  %vm1812_vm4 = vcmask 650752  }
 0x55f   : > { %1661 = vrot.lane.b32.xlu0 %v3223_v1, %s3012_s28 }
 0x5b2   : > { %v1641_v36 = vpop.permute.xlu1 %1640 }
 0x5b3   : > { %v1643_v38 = vmax.f32 %v3213_v54, %v1641_v36 }
 0x5b6   : > { %v1649_v41 = vpop.permute.xlu1 %1648 }
 0x5ba   : > { %v1658_v50 = vpop.permute.xlu1 %1657 }
 0x5be   : > { %v1666_v55 = vpop.permute.xlu1 %1665 }
 0x5c5   : > { %v1348_v3 = vpop.permute.xlu0 %1347 }
 0x5c6   : > { %v1353_v14 = vsel %vm1351_vm0, %v1348_v3, %v1352_v13 }
 0x5c7   : > { %1354 = vst [vmem:[#allocation3] sm:$0x1] %v1353_v14 }
 0x5c9   : > { %v1645_v37 = vpop.permute.xlu0 %1644 }
 0x5ca   : > { %v1647_v39 = vmax.f32 %v1643_v38, %v1645_v37 }
 0x5cc   : > { %v1651_v43 = vmax.f32 %v1647_v39, %v1649_v41 }
 0x5cd   : > { %v1654_v46 = vpop.permute.xlu0 %1653 }
 0x5ce   : > { %v1360_v15 = vld [vmem:[#allocation3] sm:$0x1]  ;;  %v1656_v49 = vmax.f32 %v1651_v43, %v1654_v46 }
 0x5cf   : > { %1495 = vmatmul.mubr.bf16.vlgmr.msra.gmra.mrb[16].mxu0 %v1360_v15 }
 0x5d0   : > { %v1660_v51 = vmax.f32 %v1656_v49, %v1658_v50 }
 0x5d1   : > { %v1662_v52 = vpop.permute.xlu0 %1661 }
 0x5d2   : > { %v1664_v53 = vmax.f32 %v1660_v51, %v1662_v52 }
 0x5d4   : > { %v3294_v56 = vmax.f32 %v1664_v53, %v1666_v55 }
 0x61e   : > { %v1885_v17 = vpop.f32.mrb[20].mxu1 }
 0x61f   : > { %v3249_v18 = vadd.f32 %v1885_v17, %v1823_v16  ;;  %v2702_v19 = vpop.f32.mrb[21].mxu1 }
 0x620   : > { %v1888_v20 = vpop.f32.mrb[22].mxu1 }
 0x621   : > { %1896 = vrot.lane.b32.xlu1 %v3249_v18, %s3008_s24  ;;  %v2703_v21 = vpop.f32.mrb[23].mxu1  ;;  %1892 = vrot.lane.b32.xlu0 %v3249_v18, %s3013_s4  ;;  %2058 = vst.msk [vmem:[%s3193_s20 + $0x4] sm:$0x3] %vm2057_vm1, %v3249_v18 }
 0x625   : > { %1904 = vrot.lane.b32.xlu1 %v3249_v18, %s3004_s7  ;;  %1900 = vrot.lane.b32.xlu0 %v3249_v18, %s3014_s5 }
 0x629   : > { %1912 = vrot.lane.b32.xlu1 %v3249_v18, %s3009_s25  ;;  %1908 = vrot.lane.b32.xlu0 %v3249_v18, %s3015_s6 }
 0x693   : > { %v1893_v57 = vpop.permute.xlu0 %1892  ;;  %v1897_v60 = vpop.permute.xlu1 %1896 }
 0x694   : > { %v1895_v59 = vmax.f32 %v3249_v18, %v1893_v57 }
 0x696   : > { %v1899_v62 = vmax.f32 %v1895_v59, %v1897_v60 }
 0x697   : > { %v1901_v58 = vpop.permute.xlu0 %1900  ;;  %v1905_v4 = vpop.permute.xlu1 %1904 }
 0x698   : > { %v1903_v2 = vmax.f32 %v1899_v62, %v1901_v58 }
 0x69a   : > { %v1907_v6 = vmax.f32 %v1903_v2, %v1905_v4 }
 0x69b   : > { %v1909_v63 = vpop.permute.xlu0 %1908  ;;  %v1913_v8 = vpop.permute.xlu1 %1912 }
 0x69c   : > { %v1911_v9 = vmax.f32 %v1907_v6, %v1909_v63 }
 0x69e   : > { %v1915_v61 = vmax.f32 %v1911_v9, %v1913_v8 }
 0x6a2   : > { %v1496_v26 = vpop.f32.mrb[16].mxu0 }
 0x6a3   : > { %v1497_v27 = vadd.f32 %v1496_v26, %v1386_v25  ;;  %v1498_v28 = vpop.f32.mrb[17].mxu0 }
 0x6a4   : > { %v1499_v29 = vpop.f32.mrb[18].mxu0 }
 0x6a5   : > { %v2488_v30 = vmul.f32 -1.442695, %v1497_v27  ;;  %v1500_v31 = vpop.f32.mrb[19].mxu0 }
 0x6a7   : > { %2902 = vpow2.f32 %v2488_v30 }
 0x6b1   : > { %v2903_v32 = vpop.eup %2902 }
 0x6b2   : > { %v1505_v33 = vadd.f32 1.0, %v2903_v32 }
 0x6b4   : > { %2904 = vrcp.f32 %v1505_v33 }
 0x6be   : > { %v2905_v34 = vpop.eup %2904 }
 0x6bf   : > { %v1508_v35 = vmul.f32 %v2905_v34, %v1497_v27 }
 0x6c1   : > { %v2065_v0 = vpack.c.bf16 %v1508_v35, %v1508_v35 }
 0x6c3   : > { %2711 = vmatmul.mubr.msk.bf16.vlgmr.msra.gmra.mrb[24].mxu1 %vm2091_vm2, %v2065_v0 }
 0x796   : > { %v2129_v42 = vpop.f32.mrb[24].mxu1 }
 0x797   : > { %v3274_v44 = vadd.f32 %v2129_v42, %v2072_v40  ;;  %v2712_v45 = vpop.f32.mrb[25].mxu1 }
 0x798   : > { %v2132_v47 = vpop.f32.mrb[26].mxu1 }
 0x799   : > { %2140 = vrot.lane.b32.xlu0 %v3274_v44, %s3013_s4  ;;  %2136 = vrot.lane.b32.xlu1 %v3274_v44, %s3016_s15  ;;  %v2713_v48 = vpop.f32.mrb[27].mxu1  ;;  %2302 = vst.msk [vmem:[%s3193_s20 + $0x6] sm:$0x1] %vm2301_vm3, %v3274_v44 }
 0x79d   : > { %2148 = vrot.lane.b32.xlu0 %v3274_v44, %s3008_s24  ;;  %2144 = vrot.lane.b32.xlu1 %v3274_v44, %s3017_s16 }
 0x7a1   : > { %2156 = vrot.lane.b32.xlu0 %v3274_v44, %s3014_s5  ;;  %2152 = vrot.lane.b32.xlu1 %v3274_v44, %s3018_s17 }
 0x7a5   : > { %1916 = vrot.lane.b32.xlu0 %v3249_v18, %s3019_s18  ;;  %2160 = vrot.lane.b32.xlu1 %v3274_v44, %s3020_s19 }
 0x7a9   : > { %1674 = vrot.lane.b32.xlu0 %v3294_v56, %s3011_s27 }
 0x80b   : > { %v2141_v5 = vpop.permute.xlu0 %2140  ;;  %v2137_v11 = vpop.permute.xlu1 %2136 }
 0x80c   : > { %v2139_v13 = vmax.f32 %v3274_v44, %v2137_v11 }
 0x80e   : > { %v2143_v14 = vmax.f32 %v2139_v13, %v2141_v5 }
 0x80f   : > { %v2149_v7 = vpop.permute.xlu0 %2148  ;;  %v2145_v15 = vpop.permute.xlu1 %2144 }
 0x810   : > { %v2147_v16 = vmax.f32 %v2143_v14, %v2145_v15 }
 0x812   : > { %v2151_v17 = vmax.f32 %v2147_v16, %v2149_v7 }
 0x813   : > { %v2157_v10 = vpop.permute.xlu0 %2156  ;;  %v2153_v19 = vpop.permute.xlu1 %2152 }
 0x814   : > { %v2155_v20 = vmax.f32 %v2151_v17, %v2153_v19 }
 0x816   : > { %v2159_v21 = vmax.f32 %v2155_v20, %v2157_v10 }
 0x817   : > { %v1917_v12 = vpop.permute.xlu0 %1916  ;;  %v2161_v23 = vpop.permute.xlu1 %2160 }
 0x818   : > { %v3300_v3 = vmax.f32 %v1915_v61, %v1917_v12  ;;  %v3326_v25 = vmax.f32 %v2159_v21, %v2161_v23 }
 0x81a   : > { %1937 = vrot.lane.b32.xlu0 %v3300_v3, %s3011_s27  ;;  %1925 = vrot.lane.b32.xlu1 %v3300_v3, %s3021_s13 }
 0x81b   : > { %v1675_v22 = vpop.permute.xlu0 %1674 }
 0x81c   : > { %v1677_v24 = vsub.f32 %v3213_v54, %v1675_v22 }
 0x81e   : > { %1703 = vrot.lane.b32.xlu0 %v3294_v56, %s3010_s26  ;;  %1686 = vrot.lane.b32.xlu1 %v3294_v56, %s3012_s28  ;;  %v1678_v26 = vmul.f32 1.442695, %v1677_v24 }
 0x820   : > { %2906 = vpow2.f32 %v1678_v26 }
 0x822   : > { %1971 = vrot.lane.b32.xlu0 %v3300_v3, %s3012_s28  ;;  %1954 = vrot.lane.b32.xlu1 %v3300_v3, %s3022_s21 }
 0x826   : > { %1737 = vrot.lane.b32.xlu0 %v3294_v56, %s3009_s25  ;;  %1720 = vrot.lane.b32.xlu1 %v3294_v56, %s3005_s8 }
 0x82a   : > { %2005 = vrot.lane.b32.xlu0 %v3300_v3, %s3010_s26  ;;  %1988 = vrot.lane.b32.xlu1 %v3300_v3, %s3023_s22  ;;  %v3340_v27 = vpop.eup %2906 }
 0x82e   : > { %1771 = vrot.lane.b32.xlu0 %v3294_v56, %s3008_s24  ;;  %1754 = vrot.lane.b32.xlu1 %v3294_v56, %s3004_s7 }
 0x832   : > { %2169 = vrot.lane.b32.xlu0 %v3326_v25, %s3024_s23  ;;  %2181 = vrot.lane.b32.xlu1 %v3326_v25, %s3021_s13 }
 0x836   : > { %2198 = vrot.lane.b32.xlu0 %v3326_v25, %s3025_s29  ;;  %2215 = vrot.lane.b32.xlu1 %v3326_v25, %s3011_s27 }
 0x83a   : > { %2232 = vrot.lane.b32.xlu0 %v3326_v25, %s3026_s30  ;;  %2249 = vrot.lane.b32.xlu1 %v3326_v25, %s3022_s21 }
 0x83e   : > { %2266 = vrot.lane.b32.xlu0 %v3326_v25, %s3027_s9  ;;  %2022 = vrot.lane.b32.xlu1 %v3300_v3, %s3028_s10 }
 0x842   : > { %1681 = vrot.lane.b32.xlu1 %v3340_v27, %s3008_s24 }
 0x88c   : > { %v1926_v28 = vpop.permute.xlu1 %1925  ;;  %v1938_v29 = vpop.permute.xlu0 %1937 }
 0x88d   : > { %v1928_v30 = vsub.f32 %v3249_v18, %v1926_v28  ;;  %v1940_v31 = vsub.f32 %v3249_v18, %v1938_v29 }
 0x88f   : > { %v1929_v32 = vmul.f32 1.442695, %v1928_v30  ;;  %v1941_v33 = vmul.f32 1.442695, %v1940_v31 }
 0x890   : > { %v1687_v34 = vpop.permute.xlu1 %1686  ;;  %v1704_v35 = vpop.permute.xlu0 %1703 }
 0x891   : > { %2908 = vpow2.f32 %v1929_v32  ;;  %v1689_v0 = vsub.f32 %v3213_v54, %v1687_v34  ;;  %v1706_v36 = vsub.f32 %v3213_v54, %v1704_v35 }
 0x892   : > { %2910 = vpow2.f32 %v1941_v33 }
 0x893   : > { %v1690_v37 = vmul.f32 1.442695, %v1689_v0  ;;  %v1707_v38 = vmul.f32 1.442695, %v1706_v36 }
 0x894   : > { %v1955_v39 = vpop.permute.xlu1 %1954  ;;  %v1972_v40 = vpop.permute.xlu0 %1971 }
 0x895   : > { %2912 = vpow2.f32 %v1690_v37  ;;  %v1957_v41 = vsub.f32 %v3249_v18, %v1955_v39  ;;  %v1974_v42 = vsub.f32 %v3249_v18, %v1972_v40 }
 0x896   : > { %2914 = vpow2.f32 %v1707_v38 }
 0x897   : > { %v1958_v43 = vmul.f32 1.442695, %v1957_v41  ;;  %v1975_v45 = vmul.f32 1.442695, %v1974_v42 }
 0x898   : > { %v1721_v46 = vpop.permute.xlu1 %1720  ;;  %v1738_v47 = vpop.permute.xlu0 %1737 }
 0x899   : > { %2916 = vpow2.f32 %v1958_v43  ;;  %v1723_v48 = vsub.f32 %v3223_v1, %v1721_v46  ;;  %v1740_v49 = vsub.f32 %v3223_v1, %v1738_v47 }
 0x89a   : > { %2918 = vpow2.f32 %v1975_v45 }
 0x89b   : > { %v3352_v50 = vpop.eup %2908  ;;  %v1724_v51 = vmul.f32 1.442695, %v1723_v48  ;;  %v1741_v52 = vmul.f32 1.442695, %v1740_v49 }
 0x89c   : > { %v3354_v53 = vpop.eup %2910  ;;  %1932 = vrot.lane.b32.xlu0 %v3352_v50, %s3013_s4  ;;  %v1989_v55 = vpop.permute.xlu1 %1988 }
 0x89d   : > { %v2006_v57 = vpop.permute.xlu0 %2005  ;;  %2920 = vpow2.f32 %v1724_v51  ;;  %v1991_v58 = vsub.f32 %v3249_v18, %v1989_v55  ;;  %1944 = vrot.lane.b32.xlu1 %v3354_v53, %s3008_s24  ;;  %v1948_v55 = vmul.f32 2.0, %v3354_v53 }
 0x89e   : > { %v2008_v59 = vsub.f32 %v3249_v18, %v2006_v57  ;;  %2922 = vpow2.f32 %v1741_v52  ;;  %v1669_v57 = vsub.f32 %v3213_v54, %v3294_v56 }
 0x89f   : > { %v3362_v60 = vpop.eup %2912  ;;  %v1992_v62 = vmul.f32 1.442695, %v1991_v58 }
 0x8a0   : > { %v2009_v63 = vmul.f32 1.442695, %v2008_v59  ;;  %v3364_v2 = vpop.eup %2914  ;;  %1693 = vrot.lane.b32.xlu0 %v3362_v60, %s3004_s7  ;;  %v1755_v4 = vpop.permute.xlu1 %1754  ;;  %v1697_v52 = vmul.f32 2.0, %v3362_v60  ;;  %v1670_v58 = vmul.f32 1.442695, %v1669_v57 }
 0x8a1   : > { %v1772_v5 = vpop.permute.xlu0 %1771  ;;  %2924 = vpow2.f32 %v1992_v62  ;;  %v1757_v6 = vsub.f32 %v3223_v1, %v1755_v4  ;;  %1710 = vrot.lane.b32.xlu1 %v3364_v2, %s3009_s25  ;;  %v1920_v62 = vsub.f32 %v3249_v18, %v3300_v3 }
 0x8a2   : > { %v1774_v7 = vsub.f32 %v3223_v1, %v1772_v5  ;;  %2926 = vpow2.f32 %v2009_v63 }
 0x8a3   : > { %v3372_v8 = vpop.eup %2916  ;;  %v1758_v9 = vmul.f32 1.442695, %v1757_v6  ;;  %v1921_v5 = vmul.f32 1.442695, %v1920_v62 }
 0x8a4   : > { %v1775_v10 = vmul.f32 1.442695, %v1774_v7  ;;  %v3374_v11 = vpop.eup %2918  ;;  %1961 = vrot.lane.b32.xlu0 %v3372_v8, %s3014_s5  ;;  %v2182_v61 = vpop.permute.xlu1 %2181 }
 0x8a5   : > { %v2170_v12 = vpop.permute.xlu0 %2169  ;;  %2928 = vpow2.f32 %v1758_v9  ;;  %v2184_v13 = vsub.f32 %v3274_v44, %v2182_v61  ;;  %1978 = vrot.lane.b32.xlu1 %v3374_v11, %s3004_s7  ;;  %v2164_v9 = vsub.f32 %v3274_v44, %v3326_v25 }
 0x8a6   : > { %v2172_v1 = vsub.f32 %v3274_v44, %v2170_v12  ;;  %2930 = vpow2.f32 %v1775_v10 }
 0x8a7   : > { %v3382_v14 = vpop.eup %2920  ;;  %v2185_v15 = vmul.f32 1.442695, %v2184_v13  ;;  %v2165_v56 = vmul.f32 1.442695, %v2164_v9  ;;  %v2045_v9 = vld [vmem:[%s3527_s2 + $0x90] ss:$0 sm:$0xff] }
 0x8a8   : > { %v2173_v16 = vmul.f32 1.442695, %v2172_v1  ;;  %v3384_v17 = vpop.eup %2922  ;;  %1727 = vrot.lane.b32.xlu0 %v3382_v14, %s3005_s8  ;;  %v2216_v19 = vpop.permute.xlu1 %2215 }
 0x8a9   : > { %v2199_v20 = vpop.permute.xlu0 %2198  ;;  %2932 = vpow2.f32 %v2185_v15  ;;  %v2218_v21 = vsub.f32 %v3274_v44, %v2216_v19  ;;  %1744 = vrot.lane.b32.xlu1 %v3384_v17, %s3010_s26 }
 0x8aa   : > { %v2201_v22 = vsub.f32 %v3274_v44, %v2199_v20  ;;  %2934 = vpow2.f32 %v2173_v16 }
 0x8ab   : > { %v3392_v23 = vpop.eup %2924  ;;  %v2219_v24 = vmul.f32 1.442695, %v2218_v21 }
 0x8ac   : > { %v2202_v26 = vmul.f32 1.442695, %v2201_v22  ;;  %v3394_v28 = vpop.eup %2926  ;;  %1995 = vrot.lane.b32.xlu0 %v3392_v23, %s3015_s6  ;;  %v2250_v29 = vpop.permute.xlu1 %2249 }
 0x8ad   : > { %v2233_v30 = vpop.permute.xlu0 %2232  ;;  %2936 = vpow2.f32 %v2219_v24  ;;  %v2252_v31 = vsub.f32 %v3274_v44, %v2250_v29  ;;  %2012 = vrot.lane.b32.xlu1 %v3394_v28, %s3009_s25 }
 0x8ae   : > { %v2235_v32 = vsub.f32 %v3274_v44, %v2233_v30  ;;  %2938 = vpow2.f32 %v2202_v26 }
 0x8af   : > { %v3402_v33 = vpop.eup %2928  ;;  %v2253_v34 = vmul.f32 1.442695, %v2252_v31 }
 0x8b0   : > { %v2236_v35 = vmul.f32 1.442695, %v2235_v32  ;;  %v3404_v0 = vpop.eup %2930  ;;  %1761 = vrot.lane.b32.xlu0 %v3402_v33, %s3012_s28  ;;  %v2023_v36 = vpop.permute.xlu1 %2022 }
 0x8b1   : > { %v2267_v37 = vpop.permute.xlu0 %2266  ;;  %2940 = vpow2.f32 %v2253_v34  ;;  %v2025_v38 = vsub.f32 %v3249_v18, %v2023_v36  ;;  %1778 = vrot.lane.b32.xlu1 %v3404_v0, %s3011_s27  ;;  %v1965_v34 = vmul.f32 3.0, %v3372_v8 }
 0x8b2   : > { %v2269_v39 = vsub.f32 %v3274_v44, %v2267_v37  ;;  %2942 = vpow2.f32 %v2236_v35 }
 0x8b3   : > { %v3412_v40 = vpop.eup %2932  ;;  %v2026_v41 = vmul.f32 1.442695, %v2025_v38 }
 0x8b4   : > { %v2270_v42 = vmul.f32 1.442695, %v2269_v39  ;;  %v3414_v43 = vpop.eup %2934  ;;  %2188 = vrot.lane.b32.xlu0 %v3412_v40, %s3013_s4  ;;  %v1682_v59 = vpop.permute.xlu1 %1681 }
 0x8b5   : > { %2944 = vpow2.f32 %v2026_v41  ;;  %2176 = vrot.lane.b32.xlu1 %v3414_v43, %s3016_s15 }
 0x8b6   : > { %2946 = vpow2.f32 %v2270_v42  ;;  %v1731_v42 = vmul.f32 4.0, %v3382_v14  ;;  %v1714_v14 = vmul.f32 3.0, %v3364_v2 }
 0x8b7   : > { %v3420_v45 = vpop.eup %2936  ;;  %2948 = vpow2.f32 %v1670_v58  ;;  %v1999_v58 = vmul.f32 5.0, %v3392_v23 }
 0x8b8   : > { %v3422_v46 = vpop.eup %2938  ;;  %2222 = vrot.lane.b32.xlu0 %v3420_v45, %s3008_s24  ;;  %2950 = vpow2.f32 %v1921_v5 }
 0x8b9   : > { %2205 = vrot.lane.b32.xlu1 %v3422_v46, %s3017_s16  ;;  %2952 = vpow2.f32 %v2165_v56 }
 0x8bb   : > { %v3428_v47 = vpop.eup %2940 }
 0x8bc   : > { %v3430_v48 = vpop.eup %2942  ;;  %2256 = vrot.lane.b32.xlu0 %v3428_v47, %s3014_s5  ;;  %v2260_v2 = vmul.f32 6.0, %v3428_v47  ;;  %v2209_v47 = vmul.f32 3.0, %v3422_v46 }
 0x8bd   : > { %2239 = vrot.lane.b32.xlu1 %v3430_v48, %s3018_s17 }
 0x8bf   : > { %v3436_v49 = vpop.eup %2944 }
 0x8c0   : > { %v3438_v51 = vpop.eup %2946  ;;  %2029 = vrot.lane.b32.xlu0 %v3436_v49, %s3019_s18 }
 0x8c1   : > { %2273 = vrot.lane.b32.xlu1 %v3438_v51, %s3020_s19  ;;  %v2949_v7 = vpop.eup %2948  ;;  %v2277_v46 = vmul.f32 7.0, %v3438_v51 }
 0x8c2   : > { %v1684_v53 = vadd.f32 %v2949_v7, %v1682_v59  ;;  %v2951_v16 = vpop.eup %2950 }
 0x8c3   : > { %v2953_v29 = vpop.eup %2952 }
 0x8c4   : > { %1699 = vrot.lane.b32.xlu0 %v1697_v52, %s3008_s24 }
 0x8c5   : > { %1950 = vrot.lane.b32.xlu1 %v1948_v55, %s3013_s4 }
 0x90e   : > { %v1933_v63 = vpop.permute.xlu0 %1932 }
 0x90f   : > { %v1945_v4 = vpop.permute.xlu1 %1944  ;;  %v1935_v19 = vadd.f32 %v2951_v16, %v1933_v63 }
 0x911   : > { %v1947_v26 = vadd.f32 %v1945_v4, %v1935_v19  ;;  %v1765_v4 = vmul.f32 6.0, %v3402_v33  ;;  %v1748_v33 = vmul.f32 5.0, %v3384_v17  ;;  %v1794_v17 = vld [vmem:[%s3527_s2 + $0x80] ss:$0 sm:$0xff] }
 0x912   : > { %v1694_v6 = vpop.permute.xlu0 %1693 }
 0x913   : > { %v1711_v60 = vpop.permute.xlu1 %1710  ;;  %v1696_v61 = vadd.f32 %v1694_v6, %v1684_v53  ;;  %v2226_v6 = vmul.f32 4.0, %v3420_v45  ;;  %v2016_v45 = vmul.f32 6.0, %v3394_v28  ;;  %v2033_v53 = vmul.f32 7.0, %v3436_v49  ;;  %v2289_v28 = vld [vmem:[%s3527_s2 + $0xa0] ss:$0 sm:$0xff] }
 0x914   : > { %v2243_v49 = vmul.f32 5.0, %v3430_v48 }
 0x915   : > { %v1713_v1 = vadd.f32 %v1711_v60, %v1696_v61  ;;  %v1982_v60 = vmul.f32 4.0, %v3374_v11  ;;  %v2192_v11 = vmul.f32 2.0, %v3412_v40  ;;  %v1782_v40 = vmul.f32 7.0, %v3404_v0 }
 0x916   : > { %v1962_v10 = vpop.permute.xlu0 %1961 }
 0x917   : > { %v1979_v54 = vpop.permute.xlu1 %1978  ;;  %v1964_v30 = vadd.f32 %v1962_v10, %v1947_v26 }
 0x919   : > { %v1981_v37 = vadd.f32 %v1979_v54, %v1964_v30 }
 0x91a   : > { %v1728_v12 = vpop.permute.xlu0 %1727 }
 0x91b   : > { %v1745_v13 = vpop.permute.xlu1 %1744  ;;  %v1730_v15 = vadd.f32 %v1728_v12, %v1713_v1 }
 0x91d   : > { %v1747_v20 = vadd.f32 %v1745_v13, %v1730_v15 }
 0x91e   : > { %v1996_v18 = vpop.permute.xlu0 %1995 }
 0x91f   : > { %v2013_v3 = vpop.permute.xlu1 %2012  ;;  %v1998_v39 = vadd.f32 %v1996_v18, %v1981_v37 }
 0x921   : > { %v2015_v57 = vadd.f32 %v2013_v3, %v1998_v39 }
 0x922   : > { %v1762_v21 = vpop.permute.xlu0 %1761 }
 0x923   : > { %v1779_v22 = vpop.permute.xlu1 %1778  ;;  %v1764_v24 = vadd.f32 %v1762_v21, %v1747_v20 }
 0x925   : > { %v1781_v44 = vadd.f32 %v1779_v22, %v1764_v24 }
 0x926   : > { %v2189_v25 = vpop.permute.xlu0 %2188 }
 0x927   : > { %v2177_v31 = vpop.permute.xlu1 %2176  ;;  %1789 = vrot.lane.b32.xlu1 %v1781_v44, %s3011_s27 }
 0x928   : > { %v2179_v32 = vadd.f32 %v2953_v29, %v2177_v31 }
 0x92a   : > { %v2191_v35 = vadd.f32 %v2189_v25, %v2179_v32  ;;  %v2223_v36 = vpop.permute.xlu0 %2222 }
 0x92b   : > { %v2206_v38 = vpop.permute.xlu1 %2205  ;;  %1967 = vrot.lane.b32.xlu1 %v1965_v34, %s3008_s24 }
 0x92c   : > { %v2208_v41 = vadd.f32 %v2206_v38, %v2191_v35 }
 0x92e   : > { %v2257_v52 = vpop.permute.xlu0 %2256  ;;  %v2225_v55 = vadd.f32 %v2223_v36, %v2208_v41 }
 0x92f   : > { %1733 = vrot.lane.b32.xlu1 %v1731_v42, %s3009_s25  ;;  %v2240_v59 = vpop.permute.xlu1 %2239 }
 0x930   : > { %v2242_v63 = vadd.f32 %v2240_v59, %v2225_v55 }
 0x932   : > { %v2030_v62 = vpop.permute.xlu0 %2029  ;;  %v2259_v5 = vadd.f32 %v2257_v52, %v2242_v63 }
 0x933   : > { %v2032_v8 = vadd.f32 %v2030_v62, %v2015_v57  ;;  %2001 = vrot.lane.b32.xlu1 %v1999_v58, %s3004_s7  ;;  %v2274_v23 = vpop.permute.xlu1 %2273 }
 0x934   : > { %v2276_v7 = vadd.f32 %v2274_v23, %v2259_v5 }
 0x935   : > { %2040 = vrot.lane.b32.xlu0 %v2032_v8, %s3021_s13 }
 0x936   : > { %v1700_v56 = vpop.permute.xlu0 %1699 }
 0x937   : > { %1767 = vrot.lane.b32.xlu1 %v1765_v4, %s3010_s26  ;;  %v1951_v10 = vpop.permute.xlu1 %1950  ;;  %v1702_v19 = vadd.f32 %v3340_v27, %v1700_v56 }
 0x938   : > { %v1953_v21 = vadd.f32 %v3352_v50, %v1951_v10 }
 0x939   : > { %1716 = vrot.lane.b32.xlu0 %v1714_v14, %s3004_s7 }
 0x93b   : > { %2228 = vrot.lane.b32.xlu1 %v2226_v6, %s3017_s16 }
 0x93d   : > { %1984 = vrot.lane.b32.xlu0 %v1982_v60, %s3014_s5 }
 0x93f   : > { %2284 = vrot.lane.b32.xlu1 %v2276_v7, %s3024_s23  ;;  %v1795_v7 = vld [vmem:[%s3527_s2 + $0xb0] sm:$0xf] }
 0x941   : > { %1750 = vrot.lane.b32.xlu0 %v1748_v33, %s3005_s8 }
 0x943   : > { %2262 = vrot.lane.b32.xlu1 %v2260_v2, %s3018_s17 }
 0x945   : > { %2018 = vrot.lane.b32.xlu0 %v2016_v45, %s3015_s6  ;;  %v2046_v45 = vld [vmem:[%s3527_s2 + $0xc0] sm:$0x3] }
 0x947   : > { %2035 = vrot.lane.b32.xlu1 %v2033_v53, %s3009_s25  ;;  %v2290_v53 = vld [vmem:[%s3527_s2 + $0xd0] ss:$0 sm:$0xff] }
 0x949   : > { %2194 = vrot.lane.b32.xlu0 %v2192_v11, %s3016_s15 }
 0x94b   : > { %1797 = vrot.lane.b32.xlu1 %v1794_v17, %s3009_s25 }
 0x94d   : > { %2211 = vrot.lane.b32.xlu0 %v2209_v47, %s3013_s4 }
 0x94f   : > { %2292 = vrot.lane.b32.xlu1 %v2289_v28, %s3026_s30 }
 0x951   : > { %2245 = vrot.lane.b32.xlu0 %v2243_v49, %s3008_s24 }
 0x955   : > { %1784 = vrot.lane.b32.xlu0 %v1782_v40, %s3012_s28 }
 0x959   : > { %2279 = vrot.lane.b32.xlu0 %v2277_v46, %s3014_s5 }
 0x95d   : > { %2048 = vrot.lane.b32.xlu0 %v2045_v9, %s3023_s22 }
 0x999   : > { %v1790_v48 = vpop.permute.xlu1 %1789 }
 0x99a   : > { %2954 = vrcp.f32 %v1790_v48 }
 0x99d   : > { %v1968_v61 = vpop.permute.xlu1 %1967 }
 0x99e   : > { %v1970_v26 = vadd.f32 %v1968_v61, %v1953_v21 }
 0x9a1   : > { %v1734_v54 = vpop.permute.xlu1 %1733 }
 0x9a4   : > { %v2955_v52 = vpop.eup %2954 }
 0x9a5   : > { %v2002_v12 = vpop.permute.xlu1 %2001 }
 0x9a7   : > { %v2041_v13 = vpop.permute.xlu0 %2040 }
 0x9a8   : > { %2956 = vrcp.f32 %v2041_v13 }
 0x9a9   : > { %v1768_v0 = vpop.permute.xlu1 %1767 }
 0x9ab   : > { %v1717_v1 = vpop.permute.xlu0 %1716 }
 0x9ac   : > { %v1719_v22 = vadd.f32 %v1717_v1, %v1702_v19 }
 0x9ad   : > { %v2229_v18 = vpop.permute.xlu1 %2228 }
 0x9ae   : > { %v1736_v30 = vadd.f32 %v1734_v54, %v1719_v22 }
 0x9af   : > { %v1985_v15 = vpop.permute.xlu0 %1984 }
 0x9b0   : > { %v1987_v29 = vadd.f32 %v1985_v15, %v1970_v26 }
 0x9b1   : > { %v2285_v3 = vpop.permute.xlu1 %2284 }
 0x9b2   : > { %2958 = vrcp.f32 %v2285_v3  ;;  %v2004_v27 = vadd.f32 %v2002_v12, %v1987_v29  ;;  %v2957_v59 = vpop.eup %2956 }
 0x9b3   : > { %v1751_v51 = vpop.permute.xlu0 %1750 }
 0x9b4   : > { %v1753_v32 = vadd.f32 %v1751_v51, %v1736_v30 }
 0x9b5   : > { %v2263_v24 = vpop.permute.xlu1 %2262 }
 0x9b6   : > { %v1770_v50 = vadd.f32 %v1768_v0, %v1753_v32 }
 0x9b7   : > { %v2019_v16 = vpop.permute.xlu0 %2018 }
 0x9b8   : > { %v2021_v37 = vadd.f32 %v2019_v16, %v2004_v27 }
 0x9b9   : > { %v2036_v35 = vpop.permute.xlu1 %2035 }
 0x9bb   : > { %v2195_v20 = vpop.permute.xlu0 %2194 }
 0x9bc   : > { %v2197_v44 = vadd.f32 %v3414_v43, %v2195_v20  ;;  %v2038_v43 = vadd.f32 %v2036_v35, %v2021_v37  ;;  %v2959_v63 = vpop.eup %2958 }
 0x9bd   : > { %v1798_v41 = vpop.permute.xlu1 %1797 }
 0x9be   : > { %v2044_v5 = vmul.f32 %v2957_v59, %v2038_v43 }
 0x9bf   : > { %v2212_v25 = vpop.permute.xlu0 %2211 }
 0x9c0   : > { %v2214_v31 = vadd.f32 %v2212_v25, %v2197_v44 }
 0x9c1   : > { %v2293_v4 = vpop.permute.xlu1 %2292 }
 0x9c2   : > { %v2231_v34 = vadd.f32 %v2229_v18, %v2214_v31 }
 0x9c3   : > { %v2246_v36 = vpop.permute.xlu0 %2245 }
 0x9c4   : > { %v2248_v38 = vadd.f32 %v2246_v36, %v2231_v34 }
 0x9c6   : > { %v2265_v57 = vadd.f32 %v2263_v24, %v2248_v38 }
 0x9c7   : > { %v1785_v39 = vpop.permute.xlu0 %1784 }
 0x9c8   : > { %v1787_v42 = vadd.f32 %v1785_v39, %v1770_v50 }
 0x9ca   : > { %v1793_v55 = vmul.f32 %v2955_v52, %v1787_v42 }
 0x9cb   : > { %v2280_v58 = vpop.permute.xlu0 %2279 }
 0x9cc   : > { %v1800_v62 = vmul.f32 %v1798_v41, %v1793_v55  ;;  %v2282_v8 = vadd.f32 %v2280_v58, %v2265_v57 }
 0x9ce   : > { %1802 = vrot.lane.b32.xlu0 %v1800_v62, %s3010_s26  ;;  %v2288_v14 = vmul.f32 %v2959_v63, %v2282_v8 }
 0x9cf   : > { %v2049_v6 = vpop.permute.xlu0 %2048 }
 0x9d0   : > { %v2295_v23 = vmul.f32 %v2293_v4, %v2288_v14  ;;  %v2051_v60 = vmul.f32 %v2049_v6, %v2044_v5 }
 0x9d2   : > { %2297 = vrot.lane.b32.xlu0 %v2295_v23, %s3018_s17  ;;  %2053 = vrot.lane.b32.xlu1 %v2051_v60, %s3015_s6 }
 0xa40   : > { %v1803_v33 = vpop.permute.xlu0 %1802 }
 0xa41   : > { %v1805_v2 = vadd.f32 %v1803_v33, %v1795_v7 }
 0xa43   : > { %1809 = vrot.lane.b32.xlu1 %v1805_v2, %s3005_s8 }
 0xa44   : > { %v2054_v11 = vpop.permute.xlu1 %2053  ;;  %v2298_v17 = vpop.permute.xlu0 %2297 }
 0xa45   : > { %v2056_v47 = vadd.f32 %v2054_v11, %v2046_v45  ;;  %v2300_v28 = vadd.f32 %v2298_v17, %v2290_v53 }
 0xa47   : > { %2060 = vrot.lane.b32.xlu0 %v2056_v47, %s3012_s28  ;;  %2304 = vrot.lane.b32.xlu1 %v2300_v28, %s3011_s27 }
 0xab5   : > { %v1810_v49 = vpop.permute.xlu1 %1809 }
 0xab6   : > { %1813 = vst.msk [vmem:[%s3193_s20] sm:$0xf] %vm1812_vm4, %v1810_v49 }
 0xab9   : > { %v2305_v40 = vpop.permute.xlu1 %2304  ;;  %v2061_v46 = vpop.permute.xlu0 %2060 }
 0xaba   : > { %2308 = vst.msk [vmem:[%s3193_s20 + $0x6] sm:$0x1] %vm2307_vm5, %v2305_v40 }
 0xabb   : > { %2064 = vst.msk [vmem:[%s3193_s20 + $0x4] sm:$0x3] %vm2063_vm6, %v2061_v46 }
 0xabc PF: > { %s14_s12 = sadd.s32 1, %s2998_s12  }
 0xabd   : > { %p11_p3 = scmp.ge.s32.totalorder %s14_s12, 4  }
 0xabf   :  { %13 = sbr.rel (!%p11_p3) target bundleno = 1 (0x1), region = 73 }
 0xac6   :  { %2328 = vsyncpa [#allocation5], 1 }
 0xac7   :  { %2330 = vsyncpa [#allocation5 + $0x1], 1 }

</bundles_post_ra>
